<compile_context>
chip_gen: v6e
topology: v6e:2x2x1
jax: 0.10.0
libtpu: 0.0.40
codegen_flags: <defaults>
</compile_context>

<pallas_src>
import functools

import numpy as np

import jax
import jax.numpy as jnp
from jax.experimental import pallas as pl
from jax.experimental.pallas import tpu as pltpu


# ----------------------------- fused Pallas kernel -------------------------- #

def fused_head_kernel(boxes_ref, feats_ref, wbig_ref, bconv_ref, w1_hbm_ref,
                      b1_ref, w2_ref, b2_ref, o_ref,
                      xpad_ref, act_ref, w1_vmem_ref, w1_sem,
                      *, N, C, H, W, KH, Cout):
    """Whole PositionalDensityHead forward for the batch in one invocation.

    boxes_ref : (N, 4)            SMEM   hand boxes (scalars, broadcast below)
    feats_ref : (N, C, H, W)      VMEM   proposal features, NCHW as given
    wbig_ref  : (KH, Cin*W, Cout*W) VMEM conv weights, kw-shift + channel mix folded
    bconv_ref : (1, Cout*W)       VMEM   conv bias expanded to the lane layout
    w1_hbm_ref: (H*Cout*W, F1)    HBM    FC1 weight (manually DMA'd / prefetched)
    b1_ref    : (1, F1)           VMEM
    w2_ref    : (F1, F2)          VMEM   FC2 weight (pre-transposed)
    b2_ref    : (1, F2)           VMEM
    o_ref     : (N, F2)                  pred_mu_deltas
    xpad_ref  : (N, H+2, Cin*W)   VMEM scratch  vertically zero-padded input
    act_ref   : (N*H, Cout*W)     VMEM scratch  conv activation (lane-dense)
    w1_vmem_ref: (H*Cout*W, F1)   VMEM scratch  FC1 weight landing buffer
    w1_sem    : DMA semaphore
    """
    Cin = C + 4
    CinW = Cin * W
    CoutW = Cout * W

    # (1) Kick off the largest HBM transfer (FC1 weight, 256 KiB) immediately
    #     so it overlaps with input prep + conv.  Wait only before the FC1 dot.
    w1_copy = pltpu.make_async_copy(w1_hbm_ref, w1_vmem_ref, w1_sem)
    w1_copy.start()

    # (2) Build the vertically zero-padded, channel-on-lane input in VMEM:
    #     xpad[n, hp, cin*W + w];  hp = 0 and H+1 are the zero pad rows.
    #     The torch cat([features, broadcast(hand_boxes)], dim=1) becomes a
    #     lane concat of 4 feature channels + 4 box constants -> one full-lane
    #     (H, Cin*W) store per sample (no masked partial stores).
    zero_row = jnp.zeros((1, CinW), jnp.float32)
    for n in range(N):
        xpad_ref[n, 0:1, :] = zero_row
        xpad_ref[n, H + 1:H + 2, :] = zero_row
        pieces = [feats_ref[n, c, :, :] for c in range(C)]
        pieces += [jnp.full((H, W), boxes_ref[n, j], jnp.float32)
                   for j in range(4)]
        xpad_ref[n, 1:1 + H, :] = jnp.concatenate(pieces, axis=1)

    # (3) Conv(KxK, pad) + bias + ReLU as KH lane-dense GEMMs:
    #     rows = (n, h) = N*H, lanes = (cout, w) = Cout*W.  Horizontal taps and
    #     channel mixing live in wbig[kh] (border columns simply absent, i.e.
    #     zero); vertical taps are sublane-shifted reads of xpad.
    acc = jnp.zeros((N * H, CoutW), jnp.float32)
    for kh in range(KH):
        x_kh = jnp.concatenate(
            [xpad_ref[n, kh:kh + H, :] for n in range(N)], axis=0)  # (N*H, Cin*W)
        acc = acc + jnp.dot(x_kh, wbig_ref[kh, :, :],
                            preferred_element_type=jnp.float32)
    act_ref[...] = jnp.maximum(acc + bconv_ref[...], 0.0)

    # (4) Flatten each sample to one lane-dense row (1, H*Cout*W) by lane
    #     concat; the NCHW torch.flatten permutation is already folded into w1
    #     (prepare_params), so no activation transpose/relayout is needed.
    xf = jnp.concatenate(
        [jnp.concatenate(
            [act_ref[n * H + h: n * H + h + 1, :] for h in range(H)], axis=1)
         for n in range(N)],
        axis=0)                                            # (N, H*Cout*W)

    # (5) FC1 + ReLU + FC2 as single GEMMs; FC1 weight arrives via the DMA
    #     started in step (1).
    w1_copy.wait()
    h1 = jnp.dot(xf, w1_vmem_ref[...], preferred_element_type=jnp.float32)
    h1 = jnp.maximum(h1 + b1_ref[...], 0.0)
    o_ref[...] = (jnp.dot(h1, w2_ref[...], preferred_element_type=jnp.float32)
                  + b2_ref[...])


# ------------------------------ JAX wrapper --------------------------------- #

def positional_density_head_forward(hand_boxes, hand_proposal_features, prepped):
    """Forward of PositionalDensityHead (returns pred_mu_deltas).

    hand_boxes:              (N, 4)        float32
    hand_proposal_features:  (N, C, H, W)  float32  (NCHW, PyTorch convention)
    """
    N, C, H, W = hand_proposal_features.shape
    Cin = C + 4
    KH = int(prepped["KH"])
    Cout = int(prepped["Cout"])
    D1, F1 = prepped["w1p"].shape
    F2 = prepped["w2p"].shape[1]

    kernel = functools.partial(fused_head_kernel,
                               N=N, C=C, H=H, W=W, KH=KH, Cout=Cout)

    # TODO(synk): PositionalDensityLoss / PositionalDensityInference
    # (detectron2 Instances, Box2BoxTransform, smooth_l1) are framework glue
    # with no Pallas equivalent; we return pred_mu_deltas only.
    return pl.pallas_call(
        kernel,
        out_shape=jax.ShapeDtypeStruct((N, F2), jnp.float32),
        grid=(1,),
        in_specs=[
            pl.BlockSpec(memory_space=pltpu.MemorySpace.SMEM),            # hand boxes
            pl.BlockSpec((N, C, H, W), lambda i: (0, 0, 0, 0)),           # features
            pl.BlockSpec((KH, Cin * W, Cout * W), lambda i: (0, 0, 0)),   # conv wbig
            pl.BlockSpec((1, Cout * W), lambda i: (0, 0)),                # conv bias
            pl.BlockSpec(memory_space=pl.ANY),                            # w1 (HBM)
            pl.BlockSpec((1, F1), lambda i: (0, 0)),                      # b1
            pl.BlockSpec((F1, F2), lambda i: (0, 0)),                     # w2
            pl.BlockSpec((1, F2), lambda i: (0, 0)),                      # b2
        ],
        out_specs=pl.BlockSpec((N, F2), lambda i: (0, 0)),
        scratch_shapes=[
            pltpu.VMEM((N, H + 2, Cin * W), jnp.float32),   # padded input
            pltpu.VMEM((N * H, Cout * W), jnp.float32),     # conv activation
            pltpu.VMEM((D1, F1), jnp.float32),              # FC1 weight buffer
            pltpu.SemaphoreType.DMA,                        # FC1 weight DMA sem
        ],
    )(hand_boxes, hand_proposal_features,
      prepped["wbig"], prepped["bconv"], prepped["w1p"],
      prepped["b1"], prepped["w2p"], prepped["b2"])


def prepare_params(params, H, W):
    """One-time weight re-layout so the hot path does no transposes/permutes."""
    convs = params["convs"]
    assert len(convs) == 1, "this fused kernel mirrors CONV_DIMS=[(8, 3, 1)]"
    w, b, pad = convs[0]
    w = np.asarray(w, np.float32)
    b = np.asarray(b, np.float32)
    Cout, Cin, KH, KW = w.shape
    pad = int(pad)
    Ho, Wo = H + 2 * pad - KH + 1, W + 2 * pad - KW + 1
    assert (Ho, Wo) == (H, W), "kernel assumes 'same' spatial conv"

    # wbig[kh, cin*W + wi, c*W + wo] = w[c, cin, kh, wi - wo + pad]
    # (out-of-range kw at the horizontal borders simply has no row -> zero).
    wbig = np.zeros((KH, Cin * W, Cout * W), np.float32)
    for kh in range(KH):
        for kw in range(KW):
            for wo in range(W):
                wi = wo + kw - pad
                if 0 <= wi < W:
                    wbig[kh, wi::W, wo::W] = w[:, :, kh, kw].T   # (Cin, Cout)
    bconv = np.repeat(b, W).reshape(1, Cout * W)                 # bias at c*W+w

    fcs = params["fcs"]
    assert len(fcs) == 2, "fused FC head mirrors FC_DIM=[32, 4]"
    (w1, b1), (w2, b2) = fcs
    w1 = np.asarray(w1, np.float32); b1 = np.asarray(b1, np.float32)
    w2 = np.asarray(w2, np.float32); b2 = np.asarray(b2, np.float32)
    F1 = w1.shape[0]; F2 = w2.shape[0]
    assert w1.shape[1] == Cout * H * W
    # torch.flatten(NCHW) index = c*H*W + h*W + w ; kernel flatten index =
    # h*(Cout*W) + c*W + w  -> permute w1 rows once here.
    w1p = w1.reshape(F1, Cout, H, W).transpose(2, 1, 3, 0).reshape(
        H * Cout * W, F1)

    return {
        "KH": KH,
        "Cout": Cout,
        "wbig": jnp.asarray(wbig),
        "bconv": jnp.asarray(bconv),
        "w1p": jnp.asarray(np.ascontiguousarray(w1p)),
        "b1": jnp.asarray(b1.reshape(1, F1)),
        "w2p": jnp.asarray(np.ascontiguousarray(w2.T)),
        "b2": jnp.asarray(b2.reshape(1, F2)),
    }


# ------------------------------ pure-JAX reference -------------------------- #

def reference_forward(hand_boxes, feats, params):
    N, C, H, W = feats.shape
    boxes_map = jnp.broadcast_to(hand_boxes[:, :, None, None], (N, 4, H, W))
    x = jnp.concatenate([feats, boxes_map], axis=1)
    for (w, b, pad) in params["convs"]:
        x = jax.lax.conv_general_dilated(
            x, w, window_strides=(1, 1), padding=[(pad, pad), (pad, pad)],
            dimension_numbers=("NCHW", "OIHW", "NCHW"))
        x = jax.nn.relu(x + b[None, :, None, None])
    x = x.reshape(N, -1)
    fcs = params["fcs"]
    for i, (w, b) in enumerate(fcs):
        x = x @ w.T + b
        if i < len(fcs) - 1:
            x = jax.nn.relu(x)
    return x


# ----------------------------------- main ----------------------------------- #

if __name__ == "__main__":
    key = jax.random.PRNGKey(0)
    N, C, H, W = 2, 4, 16, 16          # proposals, feature channels, spatial
    Cin = C + 4                        # features + broadcast hand boxes
    Cout, K, PAD = 8, 3, 1             # CONV_DIMS = [(8, 3, 1)]
    FC_DIMS = [32, 4]                  # FC_DIM; last = 4 mu box-deltas

    ks = jax.random.split(key, 8)
    hand_boxes = jax.random.uniform(ks[0], (N, 4), jnp.float32) * float(W)
    feats = jax.random.normal(ks[1], (N, C, H, W), jnp.float32)

    params = {
        "convs": [
            (jax.random.normal(ks[2], (Cout, Cin, K, K), jnp.float32) * 0.05,
             jax.random.normal(ks[3], (Cout,), jnp.float32) * 0.01,
             PAD),
        ],
        "fcs": [
            (jax.random.normal(ks[4], (FC_DIMS[0], Cout * H * W), jnp.float32) * 0.02,
             jax.random.normal(ks[5], (FC_DIMS[0],), jnp.float32) * 0.01),
            (jax.random.normal(ks[6], (FC_DIMS[1], FC_DIMS[0]), jnp.float32) * 0.1,
             jax.random.normal(ks[7], (FC_DIMS[1],), jnp.float32) * 0.01),
        ],
    }

    prepped = prepare_params(params, H, W)      # one-time weight re-layout
    fwd = jax.jit(
        lambda hb, ft: positional_density_head_forward(hb, ft, prepped))

    pred_mu_deltas = jax.block_until_ready(fwd(hand_boxes, feats))

    ref = reference_forward(hand_boxes, feats, params)
    assert pred_mu_deltas.shape == (N, FC_DIMS[-1])
    assert jnp.allclose(pred_mu_deltas, ref, rtol=1e-4, atol=1e-4), (
        pred_mu_deltas, ref)

    print("KERNEL_OK")
</pallas_src>

<mosaic_0001>
module attributes {stable_mosaic.version = 11 : i64} {
  func.func @fused_head_kernel(%arg0: i32, %arg1: memref<2x4xf32, #tpu.memory_space<smem>>, %arg2: memref<2x4x16x16xf32, #tpu.memory_space<vmem>>, %arg3: memref<3x128x128xf32, #tpu.memory_space<vmem>>, %arg4: memref<1x128xf32, #tpu.memory_space<vmem>>, %arg5: memref<2048x32xf32, #tpu.memory_space<any>>, %arg6: memref<1x32xf32, #tpu.memory_space<vmem>>, %arg7: memref<32x4xf32, #tpu.memory_space<vmem>>, %arg8: memref<1x4xf32, #tpu.memory_space<vmem>>, %arg9: memref<2x4xf32, #tpu.memory_space<vmem>>, %arg10: memref<2x18x128xf32, #tpu.memory_space<vmem>>, %arg11: memref<32x128xf32, #tpu.memory_space<vmem>>, %arg12: memref<2048x32xf32, #tpu.memory_space<vmem>>, %arg13: memref<!tpu.dma_semaphore, #tpu.memory_space<semaphore_mem>>) attributes {dimension_semantics = [#tpu.dimension_semantics<arbitrary>], iteration_bounds = array<i64: 1>, scalar_prefetch = 0 : i64, scratch_operands = 4 : i64, tpu.core_type = #tpu.core_type<tc>, window_params = [{transform_indices = @transform_0, window_bounds = array<i64: 2, 4>}, {pipeline_mode = #tpu.pipeline_mode<synchronous>, transform_indices = @transform_1, window_bounds = array<i64: 2, 4, 16, 16>}, {pipeline_mode = #tpu.pipeline_mode<synchronous>, transform_indices = @transform_2, window_bounds = array<i64: 3, 128, 128>}, {pipeline_mode = #tpu.pipeline_mode<synchronous>, transform_indices = @transform_3, window_bounds = array<i64: 1, 128>}, {}, {pipeline_mode = #tpu.pipeline_mode<synchronous>, transform_indices = @transform_5, window_bounds = array<i64: 1, 32>}, {pipeline_mode = #tpu.pipeline_mode<synchronous>, transform_indices = @transform_6, window_bounds = array<i64: 32, 4>}, {pipeline_mode = #tpu.pipeline_mode<synchronous>, transform_indices = @transform_7, window_bounds = array<i64: 1, 4>}, {pipeline_mode = #tpu.pipeline_mode<synchronous>, transform_indices = @transform_8, window_bounds = array<i64: 2, 4>}]} {
    tpu.enqueue_dma source(%arg5 : memref<2048x32xf32, #tpu.memory_space<any>>) target(%arg12 : memref<2048x32xf32, #tpu.memory_space<vmem>>) target_semaphore(%arg13 : memref<!tpu.dma_semaphore, #tpu.memory_space<semaphore_mem>>)
    %cst = arith.constant 0.000000e+00 : f32
    %0 = vector.broadcast %cst : f32 to vector<1x128xf32>
    %c0 = arith.constant 0 : index
    %c0_0 = arith.constant 0 : index
    %c0_1 = arith.constant 0 : index
    %1 = vector.load %arg10[%c0, %c0_0, %c0_1] : memref<2x18x128xf32, #tpu.memory_space<vmem>>, vector<1x1x128xf32>
    %2 = vector.shape_cast %1 : vector<1x1x128xf32> to vector<1x128xf32>
    %3 = vector.shape_cast %0 : vector<1x128xf32> to vector<1x1x128xf32>
    tpu.vector_store %arg10[%c0, %c0_0, %c0_1], %3 {strides = array<i32>} : memref<2x18x128xf32, #tpu.memory_space<vmem>>, vector<1x1x128xf32>,
    %c0_2 = arith.constant 0 : index
    %c17 = arith.constant 17 : index
    %c0_3 = arith.constant 0 : index
    %4 = vector.load %arg10[%c0_2, %c17, %c0_3] : memref<2x18x128xf32, #tpu.memory_space<vmem>>, vector<1x1x128xf32>
    %5 = vector.shape_cast %4 : vector<1x1x128xf32> to vector<1x128xf32>
    %6 = vector.shape_cast %0 : vector<1x128xf32> to vector<1x1x128xf32>
    tpu.vector_store %arg10[%c0_2, %c17, %c0_3], %6 {strides = array<i32>} : memref<2x18x128xf32, #tpu.memory_space<vmem>>, vector<1x1x128xf32>,
    %c0_4 = arith.constant 0 : index
    %c0_5 = arith.constant 0 : index
    %c0_6 = arith.constant 0 : index
    %c0_7 = arith.constant 0 : index
    %7 = vector.load %arg2[%c0_4, %c0_5, %c0_6, %c0_7] : memref<2x4x16x16xf32, #tpu.memory_space<vmem>>, vector<1x1x16x16xf32>
    %8 = vector.shape_cast %7 : vector<1x1x16x16xf32> to vector<16x16xf32>
    %c0_8 = arith.constant 0 : index
    %c1 = arith.constant 1 : index
    %c0_9 = arith.constant 0 : index
    %c0_10 = arith.constant 0 : index
    %9 = vector.load %arg2[%c0_8, %c1, %c0_9, %c0_10] : memref<2x4x16x16xf32, #tpu.memory_space<vmem>>, vector<1x1x16x16xf32>
    %10 = vector.shape_cast %9 : vector<1x1x16x16xf32> to vector<16x16xf32>
    %c0_11 = arith.constant 0 : index
    %c2 = arith.constant 2 : index
    %c0_12 = arith.constant 0 : index
    %c0_13 = arith.constant 0 : index
    %11 = vector.load %arg2[%c0_11, %c2, %c0_12, %c0_13] : memref<2x4x16x16xf32, #tpu.memory_space<vmem>>, vector<1x1x16x16xf32>
    %12 = vector.shape_cast %11 : vector<1x1x16x16xf32> to vector<16x16xf32>
    %c0_14 = arith.constant 0 : index
    %c3 = arith.constant 3 : index
    %c0_15 = arith.constant 0 : index
    %c0_16 = arith.constant 0 : index
    %13 = vector.load %arg2[%c0_14, %c3, %c0_15, %c0_16] : memref<2x4x16x16xf32, #tpu.memory_space<vmem>>, vector<1x1x16x16xf32>
    %14 = vector.shape_cast %13 : vector<1x1x16x16xf32> to vector<16x16xf32>
    %c0_17 = arith.constant 0 : index
    %c0_18 = arith.constant 0 : index
    %15 = memref.load %arg1[%c0_17, %c0_18] : memref<2x4xf32, #tpu.memory_space<smem>>
    %16 = vector.broadcast %15 : f32 to vector<16x16xf32>
    %c0_19 = arith.constant 0 : index
    %c1_20 = arith.constant 1 : index
    %17 = memref.load %arg1[%c0_19, %c1_20] : memref<2x4xf32, #tpu.memory_space<smem>>
    %18 = vector.broadcast %17 : f32 to vector<16x16xf32>
    %c0_21 = arith.constant 0 : index
    %c2_22 = arith.constant 2 : index
    %19 = memref.load %arg1[%c0_21, %c2_22] : memref<2x4xf32, #tpu.memory_space<smem>>
    %20 = vector.broadcast %19 : f32 to vector<16x16xf32>
    %c0_23 = arith.constant 0 : index
    %c3_24 = arith.constant 3 : index
    %21 = memref.load %arg1[%c0_23, %c3_24] : memref<2x4xf32, #tpu.memory_space<smem>>
    %22 = vector.broadcast %21 : f32 to vector<16x16xf32>
    %23 = tpu.concatenate %8, %10, %12, %14, %16, %18, %20, %22 in 1 : vector<16x16xf32>, vector<16x16xf32>, vector<16x16xf32>, vector<16x16xf32>, vector<16x16xf32>, vector<16x16xf32>, vector<16x16xf32>, vector<16x16xf32> -> vector<16x128xf32>
    %c0_25 = arith.constant 0 : index
    %c1_26 = arith.constant 1 : index
    %c0_27 = arith.constant 0 : index
    %24 = vector.load %arg10[%c0_25, %c1_26, %c0_27] : memref<2x18x128xf32, #tpu.memory_space<vmem>>, vector<1x16x128xf32>
    %25 = vector.shape_cast %24 : vector<1x16x128xf32> to vector<16x128xf32>
    %26 = vector.shape_cast %23 : vector<16x128xf32> to vector<1x16x128xf32>
    tpu.vector_store %arg10[%c0_25, %c1_26, %c0_27], %26 {strides = array<i32>} : memref<2x18x128xf32, #tpu.memory_space<vmem>>, vector<1x16x128xf32>,
    %c1_28 = arith.constant 1 : index
    %c0_29 = arith.constant 0 : index
    %c0_30 = arith.constant 0 : index
    %27 = vector.load %arg10[%c1_28, %c0_29, %c0_30] : memref<2x18x128xf32, #tpu.memory_space<vmem>>, vector<1x1x128xf32>
    %28 = vector.shape_cast %27 : vector<1x1x128xf32> to vector<1x128xf32>
    %29 = vector.shape_cast %0 : vector<1x128xf32> to vector<1x1x128xf32>
    tpu.vector_store %arg10[%c1_28, %c0_29, %c0_30], %29 {strides = array<i32>} : memref<2x18x128xf32, #tpu.memory_space<vmem>>, vector<1x1x128xf32>,
    %c1_31 = arith.constant 1 : index
    %c17_32 = arith.constant 17 : index
    %c0_33 = arith.constant 0 : index
    %30 = vector.load %arg10[%c1_31, %c17_32, %c0_33] : memref<2x18x128xf32, #tpu.memory_space<vmem>>, vector<1x1x128xf32>
    %31 = vector.shape_cast %30 : vector<1x1x128xf32> to vector<1x128xf32>
    %32 = vector.shape_cast %0 : vector<1x128xf32> to vector<1x1x128xf32>
    tpu.vector_store %arg10[%c1_31, %c17_32, %c0_33], %32 {strides = array<i32>} : memref<2x18x128xf32, #tpu.memory_space<vmem>>, vector<1x1x128xf32>,
    %c1_34 = arith.constant 1 : index
    %c0_35 = arith.constant 0 : index
    %c0_36 = arith.constant 0 : index
    %c0_37 = arith.constant 0 : index
    %33 = vector.load %arg2[%c1_34, %c0_35, %c0_36, %c0_37] : memref<2x4x16x16xf32, #tpu.memory_space<vmem>>, vector<1x1x16x16xf32>
    %34 = vector.shape_cast %33 : vector<1x1x16x16xf32> to vector<16x16xf32>
    %c1_38 = arith.constant 1 : index
    %c1_39 = arith.constant 1 : index
    %c0_40 = arith.constant 0 : index
    %c0_41 = arith.constant 0 : index
    %35 = vector.load %arg2[%c1_38, %c1_39, %c0_40, %c0_41] : memref<2x4x16x16xf32, #tpu.memory_space<vmem>>, vector<1x1x16x16xf32>
    %36 = vector.shape_cast %35 : vector<1x1x16x16xf32> to vector<16x16xf32>
    %c1_42 = arith.constant 1 : index
    %c2_43 = arith.constant 2 : index
    %c0_44 = arith.constant 0 : index
    %c0_45 = arith.constant 0 : index
    %37 = vector.load %arg2[%c1_42, %c2_43, %c0_44, %c0_45] : memref<2x4x16x16xf32, #tpu.memory_space<vmem>>, vector<1x1x16x16xf32>
    %38 = vector.shape_cast %37 : vector<1x1x16x16xf32> to vector<16x16xf32>
    %c1_46 = arith.constant 1 : index
    %c3_47 = arith.constant 3 : index
    %c0_48 = arith.constant 0 : index
    %c0_49 = arith.constant 0 : index
    %39 = vector.load %arg2[%c1_46, %c3_47, %c0_48, %c0_49] : memref<2x4x16x16xf32, #tpu.memory_space<vmem>>, vector<1x1x16x16xf32>
    %40 = vector.shape_cast %39 : vector<1x1x16x16xf32> to vector<16x16xf32>
    %c1_50 = arith.constant 1 : index
    %c0_51 = arith.constant 0 : index
    %41 = memref.load %arg1[%c1_50, %c0_51] : memref<2x4xf32, #tpu.memory_space<smem>>
    %42 = vector.broadcast %41 : f32 to vector<16x16xf32>
    %c1_52 = arith.constant 1 : index
    %c1_53 = arith.constant 1 : index
    %43 = memref.load %arg1[%c1_52, %c1_53] : memref<2x4xf32, #tpu.memory_space<smem>>
    %44 = vector.broadcast %43 : f32 to vector<16x16xf32>
    %c1_54 = arith.constant 1 : index
    %c2_55 = arith.constant 2 : index
    %45 = memref.load %arg1[%c1_54, %c2_55] : memref<2x4xf32, #tpu.memory_space<smem>>
    %46 = vector.broadcast %45 : f32 to vector<16x16xf32>
    %c1_56 = arith.constant 1 : index
    %c3_57 = arith.constant 3 : index
    %47 = memref.load %arg1[%c1_56, %c3_57] : memref<2x4xf32, #tpu.memory_space<smem>>
    %48 = vector.broadcast %47 : f32 to vector<16x16xf32>
    %49 = tpu.concatenate %34, %36, %38, %40, %42, %44, %46, %48 in 1 : vector<16x16xf32>, vector<16x16xf32>, vector<16x16xf32>, vector<16x16xf32>, vector<16x16xf32>, vector<16x16xf32>, vector<16x16xf32>, vector<16x16xf32> -> vector<16x128xf32>
    %c1_58 = arith.constant 1 : index
    %c1_59 = arith.constant 1 : index
    %c0_60 = arith.constant 0 : index
    %50 = vector.load %arg10[%c1_58, %c1_59, %c0_60] : memref<2x18x128xf32, #tpu.memory_space<vmem>>, vector<1x16x128xf32>
    %51 = vector.shape_cast %50 : vector<1x16x128xf32> to vector<16x128xf32>
    %52 = vector.shape_cast %49 : vector<16x128xf32> to vector<1x16x128xf32>
    tpu.vector_store %arg10[%c1_58, %c1_59, %c0_60], %52 {strides = array<i32>} : memref<2x18x128xf32, #tpu.memory_space<vmem>>, vector<1x16x128xf32>,
    %cst_61 = arith.constant 0.000000e+00 : f32
    %53 = vector.broadcast %cst_61 : f32 to vector<32x128xf32>
    %c0_62 = arith.constant 0 : index
    %c0_63 = arith.constant 0 : index
    %c0_64 = arith.constant 0 : index
    %54 = vector.load %arg10[%c0_62, %c0_63, %c0_64] : memref<2x18x128xf32, #tpu.memory_space<vmem>>, vector<1x16x128xf32>
    %55 = vector.shape_cast %54 : vector<1x16x128xf32> to vector<16x128xf32>
    %c1_65 = arith.constant 1 : index
    %c0_66 = arith.constant 0 : index
    %c0_67 = arith.constant 0 : index
    %56 = vector.load %arg10[%c1_65, %c0_66, %c0_67] : memref<2x18x128xf32, #tpu.memory_space<vmem>>, vector<1x16x128xf32>
    %57 = vector.shape_cast %56 : vector<1x16x128xf32> to vector<16x128xf32>
    %58 = tpu.concatenate %55, %57 in 0 : vector<16x128xf32>, vector<16x128xf32> -> vector<32x128xf32>
    %c0_68 = arith.constant 0 : index
    %c0_69 = arith.constant 0 : index
    %c0_70 = arith.constant 0 : index
    %59 = vector.load %arg3[%c0_68, %c0_69, %c0_70] : memref<3x128x128xf32, #tpu.memory_space<vmem>>, vector<1x128x128xf32>
    %60 = vector.shape_cast %59 : vector<1x128x128xf32> to vector<128x128xf32>
    %cst_71 = arith.constant dense<0.000000e+00> : vector<32x128xf32>
    %61 = tpu.matmul %58, %60, %cst_71 {dimension_numbers = #tpu.dot_dimension_numbers<[1], [0], [0], [1], [0, 0, 1, 1], [], []>} : vector<32x128xf32>, vector<128x128xf32>, vector<32x128xf32> -> vector<32x128xf32>
    %62 = arith.addf %53, %61 : vector<32x128xf32>
    %c0_72 = arith.constant 0 : index
    %c1_73 = arith.constant 1 : index
    %c0_74 = arith.constant 0 : index
    %63 = vector.load %arg10[%c0_72, %c1_73, %c0_74] : memref<2x18x128xf32, #tpu.memory_space<vmem>>, vector<1x16x128xf32>
    %64 = vector.shape_cast %63 : vector<1x16x128xf32> to vector<16x128xf32>
    %c1_75 = arith.constant 1 : index
    %c1_76 = arith.constant 1 : index
    %c0_77 = arith.constant 0 : index
    %65 = vector.load %arg10[%c1_75, %c1_76, %c0_77] : memref<2x18x128xf32, #tpu.memory_space<vmem>>, vector<1x16x128xf32>
    %66 = vector.shape_cast %65 : vector<1x16x128xf32> to vector<16x128xf32>
    %67 = tpu.concatenate %64, %66 in 0 : vector<16x128xf32>, vector<16x128xf32> -> vector<32x128xf32>
    %c1_78 = arith.constant 1 : index
    %c0_79 = arith.constant 0 : index
    %c0_80 = arith.constant 0 : index
    %68 = vector.load %arg3[%c1_78, %c0_79, %c0_80] : memref<3x128x128xf32, #tpu.memory_space<vmem>>, vector<1x128x128xf32>
    %69 = vector.shape_cast %68 : vector<1x128x128xf32> to vector<128x128xf32>
    %cst_81 = arith.constant dense<0.000000e+00> : vector<32x128xf32>
    %70 = tpu.matmul %67, %69, %cst_81 {dimension_numbers = #tpu.dot_dimension_numbers<[1], [0], [0], [1], [0, 0, 1, 1], [], []>} : vector<32x128xf32>, vector<128x128xf32>, vector<32x128xf32> -> vector<32x128xf32>
    %71 = arith.addf %62, %70 : vector<32x128xf32>
    %c0_82 = arith.constant 0 : index
    %c2_83 = arith.constant 2 : index
    %c0_84 = arith.constant 0 : index
    %72 = vector.load %arg10[%c0_82, %c2_83, %c0_84] : memref<2x18x128xf32, #tpu.memory_space<vmem>>, vector<1x16x128xf32>
    %73 = vector.shape_cast %72 : vector<1x16x128xf32> to vector<16x128xf32>
    %c1_85 = arith.constant 1 : index
    %c2_86 = arith.constant 2 : index
    %c0_87 = arith.constant 0 : index
    %74 = vector.load %arg10[%c1_85, %c2_86, %c0_87] : memref<2x18x128xf32, #tpu.memory_space<vmem>>, vector<1x16x128xf32>
    %75 = vector.shape_cast %74 : vector<1x16x128xf32> to vector<16x128xf32>
    %76 = tpu.concatenate %73, %75 in 0 : vector<16x128xf32>, vector<16x128xf32> -> vector<32x128xf32>
    %c2_88 = arith.constant 2 : index
    %c0_89 = arith.constant 0 : index
    %c0_90 = arith.constant 0 : index
    %77 = vector.load %arg3[%c2_88, %c0_89, %c0_90] : memref<3x128x128xf32, #tpu.memory_space<vmem>>, vector<1x128x128xf32>
    %78 = vector.shape_cast %77 : vector<1x128x128xf32> to vector<128x128xf32>
    %cst_91 = arith.constant dense<0.000000e+00> : vector<32x128xf32>
    %79 = tpu.matmul %76, %78, %cst_91 {dimension_numbers = #tpu.dot_dimension_numbers<[1], [0], [0], [1], [0, 0, 1, 1], [], []>} : vector<32x128xf32>, vector<128x128xf32>, vector<32x128xf32> -> vector<32x128xf32>
    %80 = arith.addf %71, %79 : vector<32x128xf32>
    %c0_92 = arith.constant 0 : index
    %c0_93 = arith.constant 0 : index
    %81 = vector.load %arg4[%c0_92, %c0_93] : memref<1x128xf32, #tpu.memory_space<vmem>>, vector<1x128xf32>
    %82 = vector.broadcast %81 : vector<1x128xf32> to vector<32x128xf32>
    %83 = arith.addf %80, %82 : vector<32x128xf32>
    %cst_94 = arith.constant 0.000000e+00 : f32
    %84 = vector.broadcast %cst_94 : f32 to vector<32x128xf32>
    %85 = arith.maximumf %83, %84 : vector<32x128xf32>
    %c0_95 = arith.constant 0 : index
    %c0_96 = arith.constant 0 : index
    %86 = vector.load %arg11[%c0_95, %c0_96] : memref<32x128xf32, #tpu.memory_space<vmem>>, vector<32x128xf32>
    tpu.vector_store %arg11[%c0_95, %c0_96], %85 {strides = array<i32>} : memref<32x128xf32, #tpu.memory_space<vmem>>, vector<32x128xf32>,
    %c0_97 = arith.constant 0 : index
    %c0_98 = arith.constant 0 : index
    %87 = vector.load %arg11[%c0_97, %c0_98] : memref<32x128xf32, #tpu.memory_space<vmem>>, vector<1x128xf32>
    %c1_99 = arith.constant 1 : index
    %c0_100 = arith.constant 0 : index
    %88 = vector.load %arg11[%c1_99, %c0_100] : memref<32x128xf32, #tpu.memory_space<vmem>>, vector<1x128xf32>
    %c2_101 = arith.constant 2 : index
    %c0_102 = arith.constant 0 : index
    %89 = vector.load %arg11[%c2_101, %c0_102] : memref<32x128xf32, #tpu.memory_space<vmem>>, vector<1x128xf32>
    %c3_103 = arith.constant 3 : index
    %c0_104 = arith.constant 0 : index
    %90 = vector.load %arg11[%c3_103, %c0_104] : memref<32x128xf32, #tpu.memory_space<vmem>>, vector<1x128xf32>
    %c4 = arith.constant 4 : index
    %c0_105 = arith.constant 0 : index
    %91 = vector.load %arg11[%c4, %c0_105] : memref<32x128xf32, #tpu.memory_space<vmem>>, vector<1x128xf32>
    %c5 = arith.constant 5 : index
    %c0_106 = arith.constant 0 : index
    %92 = vector.load %arg11[%c5, %c0_106] : memref<32x128xf32, #tpu.memory_space<vmem>>, vector<1x128xf32>
    %c6 = arith.constant 6 : index
    %c0_107 = arith.constant 0 : index
    %93 = vector.load %arg11[%c6, %c0_107] : memref<32x128xf32, #tpu.memory_space<vmem>>, vector<1x128xf32>
    %c7 = arith.constant 7 : index
    %c0_108 = arith.constant 0 : index
    %94 = vector.load %arg11[%c7, %c0_108] : memref<32x128xf32, #tpu.memory_space<vmem>>, vector<1x128xf32>
    %c8 = arith.constant 8 : index
    %c0_109 = arith.constant 0 : index
    %95 = vector.load %arg11[%c8, %c0_109] : memref<32x128xf32, #tpu.memory_space<vmem>>, vector<1x128xf32>
    %c9 = arith.constant 9 : index
    %c0_110 = arith.constant 0 : index
    %96 = vector.load %arg11[%c9, %c0_110] : memref<32x128xf32, #tpu.memory_space<vmem>>, vector<1x128xf32>
    %c10 = arith.constant 10 : index
    %c0_111 = arith.constant 0 : index
    %97 = vector.load %arg11[%c10, %c0_111] : memref<32x128xf32, #tpu.memory_space<vmem>>, vector<1x128xf32>
    %c11 = arith.constant 11 : index
    %c0_112 = arith.constant 0 : index
    %98 = vector.load %arg11[%c11, %c0_112] : memref<32x128xf32, #tpu.memory_space<vmem>>, vector<1x128xf32>
    %c12 = arith.constant 12 : index
    %c0_113 = arith.constant 0 : index
    %99 = vector.load %arg11[%c12, %c0_113] : memref<32x128xf32, #tpu.memory_space<vmem>>, vector<1x128xf32>
    %c13 = arith.constant 13 : index
    %c0_114 = arith.constant 0 : index
    %100 = vector.load %arg11[%c13, %c0_114] : memref<32x128xf32, #tpu.memory_space<vmem>>, vector<1x128xf32>
    %c14 = arith.constant 14 : index
    %c0_115 = arith.constant 0 : index
    %101 = vector.load %arg11[%c14, %c0_115] : memref<32x128xf32, #tpu.memory_space<vmem>>, vector<1x128xf32>
    %c15 = arith.constant 15 : index
    %c0_116 = arith.constant 0 : index
    %102 = vector.load %arg11[%c15, %c0_116] : memref<32x128xf32, #tpu.memory_space<vmem>>, vector<1x128xf32>
    %103 = tpu.concatenate %87, %88, %89, %90, %91, %92, %93, %94, %95, %96, %97, %98, %99, %100, %101, %102 in 1 : vector<1x128xf32>, vector<1x128xf32>, vector<1x128xf32>, vector<1x128xf32>, vector<1x128xf32>, vector<1x128xf32>, vector<1x128xf32>, vector<1x128xf32>, vector<1x128xf32>, vector<1x128xf32>, vector<1x128xf32>, vector<1x128xf32>, vector<1x128xf32>, vector<1x128xf32>, vector<1x128xf32>, vector<1x128xf32> -> vector<1x2048xf32>
    %c16 = arith.constant 16 : index
    %c0_117 = arith.constant 0 : index
    %104 = vector.load %arg11[%c16, %c0_117] : memref<32x128xf32, #tpu.memory_space<vmem>>, vector<1x128xf32>
    %c17_118 = arith.constant 17 : index
    %c0_119 = arith.constant 0 : index
    %105 = vector.load %arg11[%c17_118, %c0_119] : memref<32x128xf32, #tpu.memory_space<vmem>>, vector<1x128xf32>
    %c18 = arith.constant 18 : index
    %c0_120 = arith.constant 0 : index
    %106 = vector.load %arg11[%c18, %c0_120] : memref<32x128xf32, #tpu.memory_space<vmem>>, vector<1x128xf32>
    %c19 = arith.constant 19 : index
    %c0_121 = arith.constant 0 : index
    %107 = vector.load %arg11[%c19, %c0_121] : memref<32x128xf32, #tpu.memory_space<vmem>>, vector<1x128xf32>
    %c20 = arith.constant 20 : index
    %c0_122 = arith.constant 0 : index
    %108 = vector.load %arg11[%c20, %c0_122] : memref<32x128xf32, #tpu.memory_space<vmem>>, vector<1x128xf32>
    %c21 = arith.constant 21 : index
    %c0_123 = arith.constant 0 : index
    %109 = vector.load %arg11[%c21, %c0_123] : memref<32x128xf32, #tpu.memory_space<vmem>>, vector<1x128xf32>
    %c22 = arith.constant 22 : index
    %c0_124 = arith.constant 0 : index
    %110 = vector.load %arg11[%c22, %c0_124] : memref<32x128xf32, #tpu.memory_space<vmem>>, vector<1x128xf32>
    %c23 = arith.constant 23 : index
    %c0_125 = arith.constant 0 : index
    %111 = vector.load %arg11[%c23, %c0_125] : memref<32x128xf32, #tpu.memory_space<vmem>>, vector<1x128xf32>
    %c24 = arith.constant 24 : index
    %c0_126 = arith.constant 0 : index
    %112 = vector.load %arg11[%c24, %c0_126] : memref<32x128xf32, #tpu.memory_space<vmem>>, vector<1x128xf32>
    %c25 = arith.constant 25 : index
    %c0_127 = arith.constant 0 : index
    %113 = vector.load %arg11[%c25, %c0_127] : memref<32x128xf32, #tpu.memory_space<vmem>>, vector<1x128xf32>
    %c26 = arith.constant 26 : index
    %c0_128 = arith.constant 0 : index
    %114 = vector.load %arg11[%c26, %c0_128] : memref<32x128xf32, #tpu.memory_space<vmem>>, vector<1x128xf32>
    %c27 = arith.constant 27 : index
    %c0_129 = arith.constant 0 : index
    %115 = vector.load %arg11[%c27, %c0_129] : memref<32x128xf32, #tpu.memory_space<vmem>>, vector<1x128xf32>
    %c28 = arith.constant 28 : index
    %c0_130 = arith.constant 0 : index
    %116 = vector.load %arg11[%c28, %c0_130] : memref<32x128xf32, #tpu.memory_space<vmem>>, vector<1x128xf32>
    %c29 = arith.constant 29 : index
    %c0_131 = arith.constant 0 : index
    %117 = vector.load %arg11[%c29, %c0_131] : memref<32x128xf32, #tpu.memory_space<vmem>>, vector<1x128xf32>
    %c30 = arith.constant 30 : index
    %c0_132 = arith.constant 0 : index
    %118 = vector.load %arg11[%c30, %c0_132] : memref<32x128xf32, #tpu.memory_space<vmem>>, vector<1x128xf32>
    %c31 = arith.constant 31 : index
    %c0_133 = arith.constant 0 : index
    %119 = vector.load %arg11[%c31, %c0_133] : memref<32x128xf32, #tpu.memory_space<vmem>>, vector<1x128xf32>
    %120 = tpu.concatenate %104, %105, %106, %107, %108, %109, %110, %111, %112, %113, %114, %115, %116, %117, %118, %119 in 1 : vector<1x128xf32>, vector<1x128xf32>, vector<1x128xf32>, vector<1x128xf32>, vector<1x128xf32>, vector<1x128xf32>, vector<1x128xf32>, vector<1x128xf32>, vector<1x128xf32>, vector<1x128xf32>, vector<1x128xf32>, vector<1x128xf32>, vector<1x128xf32>, vector<1x128xf32>, vector<1x128xf32>, vector<1x128xf32> -> vector<1x2048xf32>
    %121 = tpu.concatenate %103, %120 in 0 : vector<1x2048xf32>, vector<1x2048xf32> -> vector<2x2048xf32>
    tpu.wait_dma2 semaphore(%arg13 : memref<!tpu.dma_semaphore, #tpu.memory_space<semaphore_mem>>) src(%arg5 : memref<2048x32xf32, #tpu.memory_space<any>>) dst(%arg12 : memref<2048x32xf32, #tpu.memory_space<vmem>>)
    %c0_134 = arith.constant 0 : index
    %c0_135 = arith.constant 0 : index
    %122 = vector.load %arg12[%c0_134, %c0_135] : memref<2048x32xf32, #tpu.memory_space<vmem>>, vector<2048x32xf32>
    %cst_136 = arith.constant dense<0.000000e+00> : vector<2x32xf32>
    %123 = tpu.matmul %121, %122, %cst_136 {dimension_numbers = #tpu.dot_dimension_numbers<[1], [0], [0], [1], [0, 0, 1, 1], [], []>} : vector<2x2048xf32>, vector<2048x32xf32>, vector<2x32xf32> -> vector<2x32xf32>
    %c0_137 = arith.constant 0 : index
    %c0_138 = arith.constant 0 : index
    %124 = vector.load %arg6[%c0_137, %c0_138] : memref<1x32xf32, #tpu.memory_space<vmem>>, vector<1x32xf32>
    %125 = vector.broadcast %124 : vector<1x32xf32> to vector<2x32xf32>
    %126 = arith.addf %123, %125 : vector<2x32xf32>
    %cst_139 = arith.constant 0.000000e+00 : f32
    %127 = vector.broadcast %cst_139 : f32 to vector<2x32xf32>
    %128 = arith.maximumf %126, %127 : vector<2x32xf32>
    %c0_140 = arith.constant 0 : index
    %c0_141 = arith.constant 0 : index
    %129 = vector.load %arg7[%c0_140, %c0_141] : memref<32x4xf32, #tpu.memory_space<vmem>>, vector<32x4xf32>
    %cst_142 = arith.constant dense<0.000000e+00> : vector<2x4xf32>
    %130 = tpu.matmul %128, %129, %cst_142 {dimension_numbers = #tpu.dot_dimension_numbers<[1], [0], [0], [1], [0, 0, 1, 1], [], []>} : vector<2x32xf32>, vector<32x4xf32>, vector<2x4xf32> -> vector<2x4xf32>
    %c0_143 = arith.constant 0 : index
    %c0_144 = arith.constant 0 : index
    %131 = vector.load %arg8[%c0_143, %c0_144] : memref<1x4xf32, #tpu.memory_space<vmem>>, vector<1x4xf32>
    %132 = vector.broadcast %131 : vector<1x4xf32> to vector<2x4xf32>
    %133 = arith.addf %130, %132 : vector<2x4xf32>
    %c0_145 = arith.constant 0 : index
    %c0_146 = arith.constant 0 : index
    %134 = vector.load %arg9[%c0_145, %c0_146] : memref<2x4xf32, #tpu.memory_space<vmem>>, vector<2x4xf32>
    tpu.vector_store %arg9[%c0_145, %c0_146], %133 {strides = array<i32>} : memref<2x4xf32, #tpu.memory_space<vmem>>, vector<2x4xf32>,
    return
  }
  func.func @transform_0(%arg0: i32) -> (i32, i32) {
    %c0_i32 = arith.constant 0 : i32
    %c0_i32_0 = arith.constant 0 : i32
    %c0_i32_1 = arith.constant 0 : i32
    return %c0_i32, %c0_i32_0 : i32, i32
  }
  func.func @transform_1(%arg0: i32) -> (i32, i32, i32, i32) {
    %c0_i32 = arith.constant 0 : i32
    %c0_i32_0 = arith.constant 0 : i32
    %c0_i32_1 = arith.constant 0 : i32
    %c0_i32_2 = arith.constant 0 : i32
    %c0_i32_3 = arith.constant 0 : i32
    return %c0_i32, %c0_i32_0, %c0_i32_1, %c0_i32_2 : i32, i32, i32, i32
  }
  func.func @transform_2(%arg0: i32) -> (i32, i32, i32) {
    %c0_i32 = arith.constant 0 : i32
    %c0_i32_0 = arith.constant 0 : i32
    %c0_i32_1 = arith.constant 0 : i32
    %c0_i32_2 = arith.constant 0 : i32
    return %c0_i32, %c0_i32_0, %c0_i32_1 : i32, i32, i32
  }
  func.func @transform_3(%arg0: i32) -> (i32, i32) {
    %c0_i32 = arith.constant 0 : i32
    %c0_i32_0 = arith.constant 0 : i32
    %c0_i32_1 = arith.constant 0 : i32
    return %c0_i32, %c0_i32_0 : i32, i32
  }
  func.func @transform_5(%arg0: i32) -> (i32, i32) {
    %c0_i32 = arith.constant 0 : i32
    %c0_i32_0 = arith.constant 0 : i32
    %c0_i32_1 = arith.constant 0 : i32
    return %c0_i32, %c0_i32_0 : i32, i32
  }
  func.func @transform_6(%arg0: i32) -> (i32, i32) {
    %c0_i32 = arith.constant 0 : i32
    %c0_i32_0 = arith.constant 0 : i32
    %c0_i32_1 = arith.constant 0 : i32
    return %c0_i32, %c0_i32_0 : i32, i32
  }
  func.func @transform_7(%arg0: i32) -> (i32, i32) {
    %c0_i32 = arith.constant 0 : i32
    %c0_i32_0 = arith.constant 0 : i32
    %c0_i32_1 = arith.constant 0 : i32
    return %c0_i32, %c0_i32_0 : i32, i32
  }
  func.func @transform_8(%arg0: i32) -> (i32, i32) {
    %c0_i32 = arith.constant 0 : i32
    %c0_i32_0 = arith.constant 0 : i32
    %c0_i32_1 = arith.constant 0 : i32
    return %c0_i32, %c0_i32_0 : i32, i32
  }
}

</mosaic_0001>

<bundles_post_ra>
// kernel: _lambda_.1
= control target key start
LH: loop header
LB: loop body
LE: loop exit
PB: predicated region body
PF: predicated region fallthrough
CT: control target
= control target key end

     0   :  { %13 = vsyncpa [#allocation9], 0  ;;  %s2419_s0 = inlined_call_operand.hbm [shape: f32[2,4], index: 0, kind: input, shape index: {}]   ;;  %s2420_s1 = inlined_call_operand.hbm [shape: f32[2,4,16,16], index: 1, kind: input, shape index: {}]   ;;  %s2421_s2 = inlined_call_operand.hbm [shape: f32[3,128,128], index: 2, kind: input, shape index: {}]   ;;  %s2422_s3 = inlined_call_operand.vmem [shape: f32[1,128], index: 3, kind: input, shape index: {}]   ;;  %s2423_s4 = inlined_call_operand.hbm [shape: f32[2048,32], index: 4, kind: input, shape index: {}]   ;;  %s2424_s5 = inlined_call_operand.vmem [shape: f32[1,32], index: 5, kind: input, shape index: {}]   ;;  %s2425_s6 = inlined_call_operand.hbm [shape: f32[32,4], index: 6, kind: input, shape index: {}]   ;;  %s2426_s7 = inlined_call_operand.vmem [shape: f32[1,4], index: 7, kind: input, shape index: {}]   ;;  %s2427_s8 = inlined_call_operand.hbm [shape: f32[2,4], index: 8, kind: output, shape index: {}]  }
   0x1   :  { %14 = vsyncpa [#allocation7], 0 }
   0x2   :  { %15 = vsyncpa [#allocation12], 0 }
   0x3   :  { %16 = vsyncpa [#allocation8], 0  ;;  %s2208_s27 = smov [#allocation11]   ;;  %s2209_s29 = smov [#allocation10]  }
   0x4   :  { %s42_s28 = sshll.u32 %s2208_s27, 4  ;;  %s30_s30 = sshll.u32 %s2209_s29, 4  ;;  %s43_s28 = int_to_ptr.vmem [resolvable:$true] %s42_s28  ;;  %s31_s30 = int_to_ptr.vmem [resolvable:$true] %s30_s30 }
   0x5   :  { %s2098_s9 = scalar_lea.vmem %s43_s28, 6144  ;;  %p2103_p1 = scmp.lt.s32.totalorder %s43_s28, %s43_s28 }
   0x6   :  { %p2099_p0 = scmp.ne.s32.totalorder %s43_s28, %s2098_s9  ;;  %p2104_p2 = scmp.lt.s32.totalorder %s2098_s9, %s2098_s9 }
   0x8   :  { %p2105_p3 = por %p2104_p2, %p2103_p1 }
   0xa   :  { %p2106_p4 = pnand %p2105_p3, %p2099_p0 }
   0xc   :  { %2109 = shalt.err (!%p2106_p4)
}
   0xd   :  { %s2210_s10 = smov 128   ;;  %s2211_s11 = smov 8  }
   0xe   :  { %48 = dma.hbm_to_vmem [thread:$0]  %s2421_s2, 6144, %s43_s28, [#allocation12], %s2210_s10, %s2210_s10, %s2211_s11  }
   0xf   :  { %s2212_s14 = smov [#allocation6]   ;;  %s2126_s17 = scalar_lea.vmem %s31_s30, 2048 }
  0x10   :  { %24 = dma.hbm_to_smem %s2419_s0, 32, %s2212_s14, [#allocation9]  }
  0x11   :  { %p2127_p5 = scmp.ne.s32.totalorder %s31_s30, %s2126_s17  ;;  %p2131_p6 = scmp.lt.s32.totalorder %s31_s30, %s31_s30 }
  0x12   :  { %p2132_p7 = scmp.lt.s32.totalorder %s2126_s17, %s2126_s17 }
  0x14   :  { %p2133_p8 = por %p2132_p7, %p2131_p6 }
  0x16   :  { %p2134_p9 = pnand %p2133_p8, %p2127_p5 }
  0x18   :  { %2137 = shalt.err (!%p2134_p9)
}
  0x19   :  { %36 = dma.hbm_to_vmem [thread:$0]  %s2420_s1, 2048, %s31_s30, [#allocation7], %s2210_s10, %s2210_s10, %s2211_s11  }
  0x1a   :  { %s2213_s20 = smov [#allocation13]  }
  0x1b   :  { %s58_s21 = sshll.u32 %s2213_s20, 4  ;;  %s59_s21 = int_to_ptr.vmem [resolvable:$true] %s58_s21 }
  0x1c   :  { %s2146_s2 = scalar_lea.vmem %s59_s21, 512  ;;  %p2151_p11 = scmp.lt.s32.totalorder %s59_s21, %s59_s21 }
  0x1d   :  { %p2147_p10 = scmp.ne.s32.totalorder %s59_s21, %s2146_s2  ;;  %p2152_p12 = scmp.lt.s32.totalorder %s2146_s2, %s2146_s2 }
  0x1f   :  { %p2153_p13 = por %p2152_p12, %p2151_p11 }
  0x21   :  { %p2154_p0 = pnand %p2153_p13, %p2147_p10 }
  0x23   :  { %2157 = shalt.err (!%p2154_p0)
}
  0x24   :  { %64 = dma.hbm_to_vmem [thread:$0]  %s2425_s6, 512, %s59_s21, [#allocation12], %s2210_s10, %s2210_s10, %s2211_s11  }
  0x25   :  { %2198 = dma.done.wait [#allocation9], 32  }
  0x26   :  { %2199 = vsyncadd [#allocation9], 4294967264 }
  0x27   :  { %2200 = dma.done.wait [#allocation7], 2048  }
  0x28   :  { %2201 = vsyncadd [#allocation7], 4294965248 }
  0x29   :  { %2202 = dma.done.wait [#allocation12], 6656  }
  0x2a   :  { %2203 = vsyncadd [#allocation12], 4294960640 }
  0x2b   :  { %79 = sfence }
  0x2c   :  { %v99_v0 = vld [vmem:[#allocation10 + $0x20] sm:$0xff]  ;;  %v96_v1 = vld [vmem:[#allocation10 + $0x10] sm:$0xff]  ;;  %s2214_s1 = smov 32   ;;  %s2215_s23 = smov 16   ;;  %v100_v2 = vld [vmem:[#allocation10 + $0x28] sm:$0xff]  ;;  %v2216_v10 = vmov 0.0  }
  0x2d   :  { %122 = vrot.lane.b32.xlu1 %v99_v0, %s2214_s1  ;;  %114 = vrot.lane.b32.xlu0 %v96_v1, %s2215_s23  ;;  %v97_v3 = vld [vmem:[#allocation10 + $0x18] sm:$0xff]  ;;  %v261_v6 = vld [vmem:[#allocation11 + $0xf0] sm:$0xff]  ;;  %91 = vst [vmem:[#allocation2] sm:$0x1] %v2216_v10  ;;  %92 = vst [vmem:[#allocation2 + $0x11] sm:$0x1] %v2216_v10 }
  0x2e   :  { %v262_v4 = vld [vmem:[#allocation11 + $0xf8] sm:$0xff]  ;;  %v240_v7 = vld [vmem:[#allocation11 + $0x70] sm:$0xff]  ;;  %160 = vst [vmem:[#allocation2 + $0x18] sm:$0x1] %v2216_v10  ;;  %161 = vst [vmem:[#allocation2 + $0x29] sm:$0x1] %v2216_v10 }
  0x2f   :  { %v241_v5 = vld [vmem:[#allocation11 + $0x78] sm:$0xff]  ;;  %v102_v9 = vld [vmem:[#allocation10 + $0x30] sm:$0xff]  ;;  %1952 = vmatprep.subr.mxu0 %v262_v4  ;;  %v260_v11 = vld [vmem:[#allocation11 + $0xe8] sm:$0xff]  ;;  %s2217_s6 = smov 48   ;;  %s104_s24 = sld [smem:[#allocation6]]  ;;  %vm136_vm0 = vcmask 130048  }
  0x30   :  { %v103_v8 = vld [vmem:[#allocation10 + $0x38] sm:$0xff]  ;;  %1990 = vmatprep.subr.mxu1 %v241_v5  ;;  %1953 = vmatpush3.msra.mxu0 %v262_v4  ;;  %v239_v12 = vld [vmem:[#allocation11 + $0x68] sm:$0xff]  ;;  %v166_v13 = vld [vmem:[#allocation10 + $0x50] sm:$0xff]  ;;  %s1595_s25 = sld [smem:[#allocation6 + $0x1]]  ;;  %vm139_vm1 = vcmask 261120   ;;  %vm142_vm2 = vcmask 392192  }
  0x31   :  { %124 = vrot.lane.b32.xlu1 %v100_v2, %s2214_s1  ;;  %116 = vrot.lane.b32.xlu0 %v97_v3, %s2215_s23  ;;  %v167_v14 = vld [vmem:[#allocation10 + $0x58] sm:$0xff]  ;;  %v259_v15 = vld [vmem:[#allocation11 + $0xe0] sm:$0xff]  ;;  %v170_v20 = vld [vmem:[#allocation10 + $0x68] sm:$0xff]  ;;  %s2294_s26 = sld [smem:[#allocation6 + $0x2]]  ;;  %vm145_vm3 = vcmask 523264   ;;  %vm148_vm4 = vcmask 654336  }
  0x32   :  { %1991 = vmatpush3.msra.mxu1 %v241_v5  ;;  %1954 = vmatprep.subr.mxu0 %v261_v6  ;;  %v238_v16 = vld [vmem:[#allocation11 + $0x60] sm:$0xff]  ;;  %v258_v17 = vld [vmem:[#allocation11 + $0xd8] sm:$0xff]  ;;  %v257_v21 = vld [vmem:[#allocation11 + $0xd0] sm:$0xff]  ;;  %s2296_s27 = sld [smem:[#allocation6 + $0x3]]  ;;  %vm151_vm5 = vcmask 785408   ;;  %vm154_vm6 = vcmask 916480  }
  0x33   :  { %1992 = vmatprep.subr.mxu1 %v240_v7  ;;  %1955 = vmatpush3.msra.mxu0 %v261_v6  ;;  %v237_v18 = vld [vmem:[#allocation11 + $0x58] sm:$0xff]  ;;  %v169_v19 = vld [vmem:[#allocation10 + $0x60] sm:$0xff]  ;;  %v236_v22 = vld [vmem:[#allocation11 + $0x50] sm:$0xff]  ;;  %s2310_s28 = sld [smem:[#allocation6 + $0x80]]  ;;  %s2218_s10 = smov [#allocation4]  }
  0x34   :  { %1993 = vmatpush3.msra.mxu1 %v240_v7  ;;  %1956 = vmatprep.subr.mxu0 %v260_v11  ;;  %v172_v23 = vld [vmem:[#allocation10 + $0x70] sm:$0xff]  ;;  %v173_v24 = vld [vmem:[#allocation10 + $0x78] sm:$0xff]  ;;  %v256_v25 = vld [vmem:[#allocation11 + $0xc8] sm:$0xff]  ;;  %s2314_s29 = sld [smem:[#allocation6 + $0x81]]  ;;  %s87_s11 = sshll.u32 %s2218_s10, 4  ;;  %s88_s11 = int_to_ptr.vmem [resolvable:$true] %s87_s11 }
  0x35   :  { %132 = vrot.lane.b32.xlu1 %v103_v8, %s2217_s6  ;;  %130 = vrot.lane.b32.xlu0 %v102_v9, %s2217_s6  ;;  %v235_v26 = vld [vmem:[#allocation11 + $0x48] sm:$0xff]  ;;  %v255_v27 = vld [vmem:[#allocation11 + $0xc0] sm:$0xff]  ;;  %v254_v29 = vld [vmem:[#allocation11 + $0xb8] sm:$0xff]  ;;  %v105_v54 = vstv %s104_s24  ;;  %s2318_s30 = sld [smem:[#allocation6 + $0x82]]  ;;  %s2166_s12 = scalar_lea.vmem %s88_s11, 32768 }
  0x36   :  { %1994 = vmatprep.subr.mxu1 %v239_v12  ;;  %1957 = vmatpush3.msra.mxu0 %v260_v11  ;;  %v234_v28 = vld [vmem:[#allocation11 + $0x40] sm:$0xff]  ;;  %v233_v30 = vld [vmem:[#allocation11 + $0x38] sm:$0xff]  ;;  %v253_v31 = vld [vmem:[#allocation11 + $0xb0] sm:$0xff]  ;;  %v107_v55 = vstv %s1595_s25  ;;  %s2320_s9 = sld [smem:[#allocation6 + $0x83]]  ;;  %p2167_p1 = scmp.ne.s32.totalorder %s88_s11, %s2166_s12 }
  0x37   :  { %1995 = vmatpush3.msra.mxu1 %v239_v12  ;;  %1958 = vmatprep.subr.mxu0 %v259_v15  ;;  %v232_v32 = vld [vmem:[#allocation11 + $0x30] sm:$0xff]  ;;  %v252_v33 = vld [vmem:[#allocation11 + $0xa8] sm:$0xff]  ;;  %v251_v35 = vld [vmem:[#allocation11 + $0xa0] sm:$0xff]  ;;  %v109_v60 = vstv %s2294_s26  ;;  %p2171_p2 = scmp.lt.s32.totalorder %s88_s11, %s88_s11  ;;  %p2172_p3 = scmp.lt.s32.totalorder %s2166_s12, %s2166_s12 }
  0x38   :  { %1996 = vmatprep.subr.mxu1 %v238_v16  ;;  %1959 = vmatpush3.msra.mxu0 %v259_v15  ;;  %v231_v34 = vld [vmem:[#allocation11 + $0x28] sm:$0xff]  ;;  %v230_v36 = vld [vmem:[#allocation11 + $0x20] sm:$0xff]  ;;  %v250_v37 = vld [vmem:[#allocation11 + $0x98] sm:$0xff]  ;;  %v111_v63 = vstv %s2296_s27 }
  0x39   :  { %184 = vrot.lane.b32.xlu0 %v166_v13, %s2215_s23  ;;  %186 = vrot.lane.b32.xlu1 %v167_v14, %s2215_s23  ;;  %v229_v38 = vld [vmem:[#allocation11 + $0x18] sm:$0xff]  ;;  %v249_v39 = vld [vmem:[#allocation11 + $0x90] sm:$0xff]  ;;  %v248_v41 = vld [vmem:[#allocation11 + $0x88] sm:$0xff]  ;;  %p2173_p4 = por %p2172_p3, %p2171_p2 }
  0x3a   :  { %1997 = vmatpush3.msra.mxu1 %v238_v16  ;;  %1960 = vmatprep.subr.mxu0 %v258_v17  ;;  %v228_v40 = vld [vmem:[#allocation11 + $0x10] sm:$0xff]  ;;  %v227_v42 = vld [vmem:[#allocation11 + $0x8] sm:$0xff]  ;;  %v247_v43 = vld [vmem:[#allocation11 + $0x80] sm:$0xff] }
  0x3b   :  { %1998 = vmatprep.subr.mxu1 %v237_v18  ;;  %1961 = vmatpush3.msra.mxu0 %v258_v17  ;;  %v226_v44 = vld [vmem:[#allocation11] sm:$0xff]  ;;  %v453_v45 = vld [vmem:[#allocation11 + $0x178] sm:$0xff]  ;;  %v94_v49 = vld [vmem:[#allocation10 + $0x8] sm:$0xff]  ;;  %p2174_p5 = pnand %p2173_p4, %p2167_p1 }
  0x3c   :  { %1999 = vmatpush3.msra.mxu1 %v237_v18  ;;  %1962 = vmatprep.subr.mxu0 %v257_v21  ;;  %v93_v48 = vld [vmem:[#allocation10] sm:$0xff]  ;;  %v164_v8 = vld [vmem:[#allocation10 + $0x48] sm:$0xff]  ;;  %v452_v13 = vld [vmem:[#allocation11 + $0x170] sm:$0xff] }
  0x3d   :  { %192 = vrot.lane.b32.xlu0 %v169_v19, %s2214_s1  ;;  %194 = vrot.lane.b32.xlu1 %v170_v20, %s2214_s1  ;;  %v163_v6 = vld [vmem:[#allocation10 + $0x40] sm:$0xff]  ;;  %v451_v18 = vld [vmem:[#allocation11 + $0x168] sm:$0xff] }
  0x3e   :  { %2000 = vmatprep.subr.mxu1 %v236_v22  ;;  %1963 = vmatpush3.msra.mxu0 %v257_v21  ;;  %v450_v21 = vld [vmem:[#allocation11 + $0x160] sm:$0xff] }
  0x3f   :  { %2001 = vmatpush3.msra.mxu1 %v236_v22  ;;  %1964 = vmatprep.subr.mxu0 %v256_v25  ;;  %v175_v22 = vstv %s2310_s28 }
  0x40   :  { %2002 = vmatprep.subr.mxu1 %v235_v26  ;;  %1965 = vmatpush3.msra.mxu0 %v256_v25 }
  0x41   :  { %200 = vrot.lane.b32.xlu0 %v172_v23, %s2217_s6  ;;  %202 = vrot.lane.b32.xlu1 %v173_v24, %s2217_s6  ;;  %v177_v23 = vstv %s2314_s29 }
  0x42   :  { %2003 = vmatpush3.msra.mxu1 %v235_v26  ;;  %1966 = vmatprep.subr.mxu0 %v255_v27  ;;  %v449_v26 = vld [vmem:[#allocation11 + $0x158] sm:$0xff] }
  0x43   :  { %2004 = vmatprep.subr.mxu1 %v234_v28  ;;  %1967 = vmatpush3.msra.mxu0 %v255_v27  ;;  %v179_v27 = vstv %s2318_s30 }
  0x44   :  { %2005 = vmatpush3.msra.mxu1 %v234_v28  ;;  %1968 = vmatprep.subr.mxu0 %v254_v29 }
  0x45   :  { %2006 = vmatprep.subr.mxu1 %v233_v30  ;;  %1969 = vmatpush3.msra.mxu0 %v254_v29 }
  0x46   :  { %2007 = vmatpush3.msra.mxu1 %v233_v30  ;;  %1970 = vmatprep.subr.mxu0 %v253_v31 }
  0x47   :  { %2008 = vmatprep.subr.mxu1 %v232_v32  ;;  %1971 = vmatpush3.msra.mxu0 %v253_v31 }
  0x48   :  { %2009 = vmatpush3.msra.mxu1 %v232_v32  ;;  %1972 = vmatprep.subr.mxu0 %v252_v33  ;;  %v181_v32 = vstv %s2320_s9 }
  0x49   :  { %2010 = vmatprep.subr.mxu1 %v231_v34  ;;  %1973 = vmatpush3.msra.mxu0 %v252_v33 }
  0x4a   :  { %2011 = vmatpush3.msra.mxu1 %v231_v34  ;;  %1974 = vmatprep.subr.mxu0 %v251_v35 }
  0x4b   :  { %2012 = vmatprep.subr.mxu1 %v230_v36  ;;  %1975 = vmatpush3.msra.mxu0 %v251_v35  ;;  %v448_v35 = vld [vmem:[#allocation11 + $0x150] sm:$0xff] }
  0x4c   :  { %2013 = vmatpush3.msra.mxu1 %v230_v36  ;;  %1976 = vmatprep.subr.mxu0 %v250_v37 }
  0x4d   :  { %2014 = vmatprep.subr.mxu1 %v229_v38  ;;  %1977 = vmatpush3.msra.mxu0 %v250_v37 }
  0x4e   :  { %2015 = vmatpush3.msra.mxu1 %v229_v38  ;;  %1978 = vmatprep.subr.mxu0 %v249_v39 }
  0x4f   :  { %2016 = vmatprep.subr.mxu1 %v228_v40  ;;  %1979 = vmatpush3.msra.mxu0 %v249_v39 }
  0x50   :  { %2017 = vmatpush3.msra.mxu1 %v228_v40  ;;  %1980 = vmatprep.subr.mxu0 %v248_v41  ;;  %v447_v40 = vld [vmem:[#allocation11 + $0x148] sm:$0xff] }
  0x51   :  { %2018 = vmatprep.subr.mxu1 %v227_v42  ;;  %1981 = vmatpush3.msra.mxu0 %v248_v41 }
  0x52   :  { %2019 = vmatpush3.msra.mxu1 %v227_v42  ;;  %1982 = vmatprep.subr.mxu0 %v247_v43 }
  0x53   :  { %2020 = vmatprep.subr.mxu1 %v226_v44  ;;  %1983 = vmatpush3.msra.mxu0 %v247_v43  ;;  %v446_v43 = vld [vmem:[#allocation11 + $0x140] sm:$0xff] }
  0x54   :  { %2021 = vmatpush3.msra.mxu1 %v226_v44  ;;  %2028 = vmatprep.subr.mxu0 %v453_v45 }
  0x9f   :  { %v123_v46 = vpop.permute.xlu1 %122  ;;  %v115_v47 = vpop.permute.xlu0 %114 }
  0xa0   :  { %v137_v52 = vsel %vm136_vm0, %v93_v48, %v115_v47  ;;  %v443_v47 = vld [vmem:[#allocation11 + $0x128] sm:$0xff] }
  0xa1   :  { %v140_v59 = vsel %vm139_vm1, %v137_v52, %v123_v46  ;;  %v444_v46 = vld [vmem:[#allocation11 + $0x130] sm:$0xff] }
  0xa2   :  { %v440_v52 = vld [vmem:[#allocation11 + $0x110] sm:$0xff] }
  0xa3   :  { %v125_v50 = vpop.permute.xlu1 %124  ;;  %v117_v51 = vpop.permute.xlu0 %116 }
  0xa4   :  { %v138_v53 = vsel %vm136_vm0, %v94_v49, %v117_v51  ;;  %v441_v51 = vld [vmem:[#allocation11 + $0x118] sm:$0xff] }
  0xa5   :  { %v141_v57 = vsel %vm139_vm1, %v138_v53, %v125_v50  ;;  %v442_v50 = vld [vmem:[#allocation11 + $0x120] sm:$0xff]  ;;  %v439_v53 = vld [vmem:[#allocation11 + $0x108] sm:$0xff] }
  0xa7   :  { %v133_v56 = vpop.permute.xlu1 %132  ;;  %v131_v58 = vpop.permute.xlu0 %130 }
  0xa8   :  { %v144_v61 = vsel %vm142_vm2, %v141_v57, %v133_v56  ;;  %v143_v62 = vsel %vm142_vm2, %v140_v59, %v131_v58 }
  0xa9   :  { %v147_v0 = vsel %vm145_vm3, %v144_v61, %v105_v54  ;;  %v146_v1 = vsel %vm145_vm3, %v143_v62, %v105_v54  ;;  %v438_v54 = vld [vmem:[#allocation11 + $0x100] sm:$0xff] }
  0xaa   :  { %v150_v2 = vsel %vm148_vm4, %v147_v0, %v107_v55  ;;  %v149_v3 = vsel %vm148_vm4, %v146_v1, %v107_v55 }
  0xab   :  { %v153_v4 = vsel %vm151_vm5, %v150_v2, %v109_v60  ;;  %v152_v5 = vsel %vm151_vm5, %v149_v3, %v109_v60  ;;  %v185_v7 = vpop.permute.xlu0 %184  ;;  %v187_v9 = vpop.permute.xlu1 %186 }
  0xac   :  { %v156_v11 = vsel %vm154_vm6, %v153_v4, %v111_v63  ;;  %v155_v12 = vsel %vm154_vm6, %v152_v5, %v111_v63  ;;  %v206_v14 = vsel %vm136_vm0, %v163_v6, %v185_v7  ;;  %v207_v15 = vsel %vm136_vm0, %v164_v8, %v187_v9 }
  0xad   :  { %158 = vst [vmem:[#allocation2 + $0x9] sm:$0xff] %v156_v11  ;;  %157 = vst [vmem:[#allocation2 + $0x1] sm:$0xff] %v155_v12  ;;  %1984 = vmatprep.mubr.f32.mxu0 %v155_v12 }
  0xae   :  { %1985 = vmatmul.mubr.f32.vlgmr.msra.gmra.mxu0 %v156_v11 }
  0xaf   :  { %v193_v16 = vpop.permute.xlu0 %192  ;;  %v195_v17 = vpop.permute.xlu1 %194  ;;  %2029 = vmatpush3.msra.mxu0 %v453_v45  ;;  %v445_v45 = vld [vmem:[#allocation11 + $0x138] sm:$0xff] }
  0xb0   :  { %2030 = vmatprep.subr.mxu0 %v452_v13  ;;  %v208_v19 = vsel %vm139_vm1, %v206_v14, %v193_v16  ;;  %v209_v20 = vsel %vm139_vm1, %v207_v15, %v195_v17 }
  0xb1   :  { %2031 = vmatpush3.msra.mxu0 %v452_v13 }
  0xb2   :  { %2032 = vmatprep.subr.mxu0 %v451_v18 }
  0xb3   :  { %v201_v24 = vpop.permute.xlu0 %200  ;;  %v203_v25 = vpop.permute.xlu1 %202  ;;  %2033 = vmatpush3.msra.mxu0 %v451_v18 }
  0xb4   :  { %v210_v28 = vsel %vm142_vm2, %v208_v19, %v201_v24  ;;  %v211_v29 = vsel %vm142_vm2, %v209_v20, %v203_v25  ;;  %v222_v30 = vld [vmem:[#allocation2] sm:$0xff]  ;;  %v223_v31 = vld [vmem:[#allocation2 + $0x8] sm:$0xff]  ;;  %2034 = vmatprep.subr.mxu0 %v450_v21 }
  0xb5   :  { %v212_v33 = vsel %vm145_vm3, %v210_v28, %v175_v22  ;;  %v213_v34 = vsel %vm145_vm3, %v211_v29, %v175_v22  ;;  %2022 = vmatprep.mubr.f32.mxu1 %v222_v30  ;;  %2035 = vmatpush3.msra.mxu0 %v450_v21  ;;  %v433_v44 = vld [vmem:[#allocation2 + $0x2] sm:$0xff]  ;;  %v434_v55 = vld [vmem:[#allocation2 + $0xa] sm:$0xff] }
  0xb6   :  { %v214_v36 = vsel %vm148_vm4, %v212_v33, %v177_v23  ;;  %v215_v37 = vsel %vm148_vm4, %v213_v34, %v177_v23  ;;  %2023 = vmatmul.mubr.f32.vlgmr.msra.gmra.mxu1 %v223_v31  ;;  %2036 = vmatprep.subr.mxu0 %v449_v26 }
  0xb7   :  { %v216_v38 = vsel %vm151_vm5, %v214_v36, %v179_v27  ;;  %v217_v39 = vsel %vm151_vm5, %v215_v37, %v179_v27  ;;  %2037 = vmatpush3.msra.mxu0 %v449_v26 }
  0xb8   :  { %v218_v41 = vsel %vm154_vm6, %v216_v38, %v181_v32  ;;  %v219_v42 = vsel %vm154_vm6, %v217_v39, %v181_v32  ;;  %2038 = vmatprep.subr.mxu0 %v448_v35 }
  0xb9   :  { %220 = vst [vmem:[#allocation2 + $0x19] sm:$0xff] %v218_v41  ;;  %221 = vst [vmem:[#allocation2 + $0x21] sm:$0xff] %v219_v42  ;;  %2039 = vmatpush3.msra.mxu0 %v448_v35  ;;  %1987 = vmatprep.mubr.f32.mxu0 %v218_v41 }
  0xba   :  { %2040 = vmatprep.subr.mxu0 %v447_v40  ;;  %1988 = vmatmul.mubr.f32.gmra.mxu0 %v219_v42 }
  0xbb   :  { %2041 = vmatpush3.msra.mxu0 %v447_v40  ;;  %2060 = vmatprep.mubr.f32.mxu0 %v433_v44 }
  0xbc   :  { %2042 = vmatprep.subr.mxu0 %v446_v43 }
  0xbd   :  { %2043 = vmatpush3.msra.mxu0 %v446_v43 }
  0xbe   :  { %2044 = vmatprep.subr.mxu0 %v445_v45 }
  0xbf   :  { %2045 = vmatpush3.msra.mxu0 %v445_v45 }
  0xc0   :  { %v224_v48 = vld [vmem:[#allocation2 + $0x18] sm:$0xff]  ;;  %2046 = vmatprep.subr.mxu0 %v444_v46  ;;  %v225_v49 = vld [vmem:[#allocation2 + $0x20] sm:$0xff] }
  0xc1   :  { %2025 = vmatprep.mubr.f32.mxu1 %v224_v48  ;;  %2047 = vmatpush3.msra.mxu0 %v444_v46  ;;  %v435_v56 = vld [vmem:[#allocation2 + $0x1a] sm:$0xff]  ;;  %v436_v57 = vld [vmem:[#allocation2 + $0x22] sm:$0xff] }
  0xc2   :  { %2026 = vmatmul.mubr.f32.gmra.mxu1 %v225_v49  ;;  %2048 = vmatprep.subr.mxu0 %v443_v47 }
  0xc3   :  { %2049 = vmatpush3.msra.mxu0 %v443_v47 }
  0xc4   :  { %2050 = vmatprep.subr.mxu0 %v442_v50 }
  0xc5   :  { %2051 = vmatpush3.msra.mxu0 %v442_v50 }
  0xc6   :  { %2052 = vmatprep.subr.mxu0 %v441_v51 }
  0xc7   :  { %2053 = vmatpush3.msra.mxu0 %v441_v51 }
  0xc8   :  { %2054 = vmatprep.subr.mxu0 %v440_v52 }
  0xc9   :  { %2055 = vmatpush3.msra.mxu0 %v440_v52 }
  0xca   :  { %2056 = vmatprep.subr.mxu0 %v439_v53 }
  0xcb   :  { %2057 = vmatpush3.msra.mxu0 %v439_v53 }
  0xcc   :  { %2058 = vmatprep.subr.mxu0 %v438_v54 }
  0xcd   :  { %2059 = vmatpush3.msra.mxu0 %v438_v54 }
  0xce   :  { %2061 = vmatmul.mubr.f32.vlgmr.msra.gmra.mxu0 %v434_v55 }
  0xcf   :  { %2063 = vmatprep.mubr.f32.mxu0 %v435_v56 }
  0xd2   :  { %2064 = vmatmul.mubr.f32.gmra.mxu0 %v436_v57 }
  0xd3   :  { %2177 = shalt.err (!%p2174_p5)  }
  0xd4   :  { %90 = dma.hbm_to_vmem [thread:$0]  %s2423_s4, 32768, %s88_s11, [#allocation5]  ;;  %v1602_v3 = vld [vmem:[%s2422_s3] ss:$0 sm:$0xff]  ;;  %vm642_vm7 = vcmask 1040384  }
 0x16e   :  { %v1986_v58 = vpop.f32.mrf.mxu0 }
 0x170   :  { %v329_v60 = vpop.f32.mrf.mxu0 }
 0x176   :  { %v2024_v59 = vpop.f32.mrf.mxu1 }
 0x177   :  { %v420_v1 = vadd.f32 %v2024_v59, %v1986_v58 }
 0x178   :  { %v414_v62 = vpop.f32.mrf.mxu1 }
 0x179   :  { %v415_v4 = vadd.f32 %v414_v62, %v329_v60 }
 0x17a   :  { %v1989_v61 = vpop.f32.mrf.mxu0 }
 0x17c   :  { %v339_v0 = vpop.f32.mrf.mxu0 }
 0x182   :  { %v2027_v63 = vpop.f32.mrf.mxu1 }
 0x183   :  { %v430_v8 = vadd.f32 %v2027_v63, %v1989_v61 }
 0x184   :  { %v424_v6 = vpop.f32.mrf.mxu1 }
 0x185   :  { %v425_v13 = vadd.f32 %v424_v6, %v339_v0 }
 0x18e   :  { %v2062_v2 = vpop.f32.mrf.mxu0 }
 0x18f   :  { %v540_v5 = vadd.f32 %v2062_v2, %v420_v1 }
 0x190   :  { %v520_v7 = vpop.f32.mrf.mxu0 }
 0x191   :  { %v551_v9 = vadd.f32 %v1602_v3, %v540_v5  ;;  %v539_v11 = vadd.f32 %v520_v7, %v415_v4 }
 0x192   :  { %v2065_v12 = vpop.f32.mrf.mxu0 }
 0x193   :  { %v555_v14 = vmax.f32 %v551_v9, 0.0  ;;  %v550_v15 = vadd.f32 %v1602_v3, %v539_v11  ;;  %v542_v16 = vadd.f32 %v2065_v12, %v430_v8 }
 0x194   :  { %v530_v17 = vpop.f32.mrf.mxu0 }
 0x195   :  { %559 = vst [vmem:[#allocation3 + $0x8] sm:$0xff] %v555_v14  ;;  %v554_v18 = vmax.f32 %v550_v15, 0.0  ;;  %v553_v19 = vadd.f32 %v1602_v3, %v542_v16  ;;  %v541_v20 = vadd.f32 %v530_v17, %v425_v13 }
 0x197   :  { %558 = vst [vmem:[#allocation3] sm:$0xff] %v554_v18  ;;  %v557_v21 = vmax.f32 %v553_v19, 0.0  ;;  %v552_v22 = vadd.f32 %v1602_v3, %v541_v20 }
 0x199   :  { %561 = vst [vmem:[#allocation3 + $0x18] sm:$0xff] %v557_v21  ;;  %v556_v23 = vmax.f32 %v552_v22, 0.0 }
 0x19b   :  { %560 = vst [vmem:[#allocation3 + $0x10] sm:$0xff] %v556_v23 }
 0x19c   :  { %v570_v29 = vld [vmem:[#allocation3 + $0x8] sm:$0x1]  ;;  %v571_v30 = vld [vmem:[#allocation3 + $0x9] sm:$0x1]  ;;  %v572_v31 = vld [vmem:[#allocation3 + $0xa] sm:$0x1] }
 0x19d   :  { %v573_v32 = vld [vmem:[#allocation3 + $0xb] sm:$0x1]  ;;  %v574_v36 = vld [vmem:[#allocation3 + $0xc] sm:$0x1]  ;;  %v575_v37 = vld [vmem:[#allocation3 + $0xd] sm:$0x1] }
 0x19e   :  { %v576_v38 = vld [vmem:[#allocation3 + $0xe] sm:$0x1]  ;;  %v577_v39 = vld [vmem:[#allocation3 + $0xf] sm:$0x1]  ;;  %v562_v57 = vld [vmem:[#allocation3] sm:$0x1] }
 0x19f   :  { %v563_v58 = vld [vmem:[#allocation3 + $0x1] sm:$0x1]  ;;  %v564_v59 = vld [vmem:[#allocation3 + $0x2] sm:$0x1]  ;;  %v565_v3 = vld [vmem:[#allocation3 + $0x3] sm:$0x1] }
 0x1a0   :  { %v586_v24 = vld [vmem:[#allocation3 + $0x18] sm:$0x1]  ;;  %v587_v25 = vld [vmem:[#allocation3 + $0x19] sm:$0x1]  ;;  %v588_v26 = vld [vmem:[#allocation3 + $0x1a] sm:$0x1] }
 0x1a1   :  { %v589_v27 = vld [vmem:[#allocation3 + $0x1b] sm:$0x1]  ;;  %v590_v28 = vld [vmem:[#allocation3 + $0x1c] sm:$0x1]  ;;  %v591_v33 = vld [vmem:[#allocation3 + $0x1d] sm:$0x1] }
 0x1a2   :  { %v592_v34 = vld [vmem:[#allocation3 + $0x1e] sm:$0x1]  ;;  %v593_v35 = vld [vmem:[#allocation3 + $0x1f] sm:$0x1]  ;;  %v618_v40 = vrot.slane %v586_v24, 7  ;;  %v619_v41 = vrot.slane %v587_v25, 7 }
 0x1a3   :  { %v620_v42 = vrot.slane %v588_v26, 7  ;;  %v621_v43 = vrot.slane %v589_v27, 7  ;;  %v578_v44 = vld [vmem:[#allocation3 + $0x10] sm:$0x1]  ;;  %v622_v45 = vrot.slane %v590_v28, 7  ;;  %v623_v46 = vrot.slane %v591_v33, 7 }
 0x1a4   :  { %v624_v47 = vrot.slane %v592_v34, 7  ;;  %v625_v48 = vrot.slane %v593_v35, 7  ;;  %v579_v49 = vld [vmem:[#allocation3 + $0x11] sm:$0x1]  ;;  %v2347_v50 = vsel %vm642_vm7, %v570_v29, %v618_v40  ;;  %v2350_v51 = vsel %vm642_vm7, %v571_v30, %v619_v41  ;;  %v580_v54 = vld [vmem:[#allocation3 + $0x12] sm:$0x1] }
 0x1a5   :  { %v2353_v52 = vsel %vm642_vm7, %v572_v31, %v620_v42  ;;  %v2356_v53 = vsel %vm642_vm7, %v573_v32, %v621_v43  ;;  %v581_v55 = vld [vmem:[#allocation3 + $0x13] sm:$0x1]  ;;  %v582_v56 = vld [vmem:[#allocation3 + $0x14] sm:$0x1]  ;;  %v2359_v60 = vsel %vm642_vm7, %v574_v36, %v622_v45  ;;  %v2362_v61 = vsel %vm642_vm7, %v575_v37, %v623_v46  ;;  %v583_v0 = vld [vmem:[#allocation3 + $0x15] sm:$0x1] }
 0x1a6   :  { %v2365_v62 = vsel %vm642_vm7, %v576_v38, %v624_v47  ;;  %v2368_v63 = vsel %vm642_vm7, %v577_v39, %v625_v48  ;;  %v584_v1 = vld [vmem:[#allocation3 + $0x16] sm:$0x1]  ;;  %v585_v2 = vld [vmem:[#allocation3 + $0x17] sm:$0x1]  ;;  %v610_v4 = vrot.slane %v578_v44, 7  ;;  %v611_v5 = vrot.slane %v579_v49, 7 }
 0x1a7   :  { %v612_v6 = vrot.slane %v580_v54, 7  ;;  %v613_v7 = vrot.slane %v581_v55, 7  ;;  %v566_v8 = vld [vmem:[#allocation3 + $0x4] sm:$0x1]  ;;  %v614_v9 = vrot.slane %v582_v56, 7  ;;  %v615_v11 = vrot.slane %v583_v0, 7 }
 0x1a8   :  { %v616_v12 = vrot.slane %v584_v1, 7  ;;  %v617_v13 = vrot.slane %v585_v2, 7  ;;  %v567_v14 = vld [vmem:[#allocation3 + $0x5] sm:$0x1]  ;;  %v568_v15 = vld [vmem:[#allocation3 + $0x6] sm:$0x1]  ;;  %v2371_v17 = vsel %vm642_vm7, %v562_v57, %v610_v4  ;;  %v644_v18 = vsel %vm642_vm7, %v563_v58, %v611_v5 }
 0x1a9   :  { %v569_v16 = vld [vmem:[#allocation3 + $0x7] sm:$0x1]  ;;  %v2375_v19 = vsel %vm642_vm7, %v564_v59, %v612_v6  ;;  %v646_v20 = vsel %vm642_vm7, %v565_v3, %v613_v7  ;;  %v2379_v21 = vsel %vm642_vm7, %v566_v8, %v614_v9  ;;  %v2382_v22 = vsel %vm642_vm7, %v567_v14, %v615_v11 }
 0x1aa   :  { %v2385_v23 = vsel %vm642_vm7, %v568_v15, %v616_v12  ;;  %v2388_v24 = vsel %vm642_vm7, %v569_v16, %v617_v13 }
 0x1ab   :  { %2204 = dma.done.wait [#allocation5], 32768 }
 0x1ac   :  { %2205 = vsyncadd [#allocation5], 4294934528  ;;  %989 = vmatprep.mubr.f32.mxu1 %v644_v18  ;;  %1059 = vmatprep.mubr.f32.mxu0 %v646_v20  ;;  %v693_v25 = vld [vmem:[#allocation4 + $0xf8] sm:$0xff]  ;;  %v692_v29 = vld [vmem:[#allocation4 + $0xf0] sm:$0xff]  ;;  %vm2219_vm8 = vmmov 0   ;;  %s2220_s18 = smov [#allocation14]  }
 0x1ad   :  { %v725_v26 = vld [vmem:[#allocation4 + $0x1f8] sm:$0xff]  ;;  %1667 = vmatprep.subr.mxu1 %v693_v25  ;;  %v724_v30 = vld [vmem:[#allocation4 + $0x1f0] sm:$0xff]  ;;  %v691_v33 = vld [vmem:[#allocation4 + $0xe8] sm:$0xff]  ;;  %s1578_s19 = sshll.u32 %s2220_s18, 4  ;;  %vm1570_vm9 = vcmask 25600   ;;  %s1579_s19 = int_to_ptr.vmem [resolvable:$true] %s1578_s19 }
 0x1ae   :  { %v677_v27 = vld [vmem:[#allocation4 + $0x78] sm:$0xff]  ;;  %1702 = vmatprep.subr.mxu0 %v725_v26  ;;  %v676_v31 = vld [vmem:[#allocation4 + $0x70] sm:$0xff]  ;;  %v723_v34 = vld [vmem:[#allocation4 + $0x1e8] sm:$0xff]  ;;  %s2178_s20 = scalar_lea.vmem %s1579_s19, 32  ;;  %p2183_p7 = scmp.lt.s32.totalorder %s1579_s19, %s1579_s19 }
 0x1af   :  { %v709_v28 = vld [vmem:[#allocation4 + $0x178] sm:$0xff]  ;;  %1668 = vmatpush3.msra.mxu1 %v677_v27  ;;  %v708_v32 = vld [vmem:[#allocation4 + $0x170] sm:$0xff]  ;;  %v675_v35 = vld [vmem:[#allocation4 + $0x68] sm:$0xff]  ;;  %p2179_p6 = scmp.ne.s32.totalorder %s1579_s19, %s2178_s20  ;;  %p2184_p8 = scmp.lt.s32.totalorder %s2178_s20, %s2178_s20 }
 0x1b0   :  { %1703 = vmatpush3.msra.mxu0 %v709_v28  ;;  %1669 = vmatprep.subr.mxu1 %v692_v29  ;;  %v707_v36 = vld [vmem:[#allocation4 + $0x168] sm:$0xff]  ;;  %v690_v37 = vld [vmem:[#allocation4 + $0xe0] sm:$0xff]  ;;  %v689_v41 = vld [vmem:[#allocation4 + $0xd8] sm:$0xff] }
 0x1b1   :  { %1704 = vmatprep.subr.mxu0 %v724_v30  ;;  %1670 = vmatpush3.msra.mxu1 %v676_v31  ;;  %v722_v38 = vld [vmem:[#allocation4 + $0x1e0] sm:$0xff]  ;;  %v721_v42 = vld [vmem:[#allocation4 + $0x1d8] sm:$0xff]  ;;  %v688_v45 = vld [vmem:[#allocation4 + $0xd0] sm:$0xff]  ;;  %p2185_p9 = por %p2184_p8, %p2183_p7 }
 0x1b2   :  { %1705 = vmatpush3.msra.mxu0 %v708_v32  ;;  %1671 = vmatprep.subr.mxu1 %v691_v33  ;;  %v674_v39 = vld [vmem:[#allocation4 + $0x60] sm:$0xff]  ;;  %v673_v43 = vld [vmem:[#allocation4 + $0x58] sm:$0xff]  ;;  %v720_v46 = vld [vmem:[#allocation4 + $0x1d0] sm:$0xff] }
 0x1b3   :  { %1706 = vmatprep.subr.mxu0 %v723_v34  ;;  %v706_v40 = vld [vmem:[#allocation4 + $0x160] sm:$0xff]  ;;  %1672 = vmatpush3.msra.mxu1 %v675_v35  ;;  %v705_v44 = vld [vmem:[#allocation4 + $0x158] sm:$0xff]  ;;  %v672_v47 = vld [vmem:[#allocation4 + $0x50] sm:$0xff]  ;;  %p2186_p10 = pnand %p2185_p9, %p2179_p6 }
 0x1b4   :  { %1707 = vmatpush3.msra.mxu0 %v707_v36  ;;  %1673 = vmatprep.subr.mxu1 %v690_v37  ;;  %v704_v48 = vld [vmem:[#allocation4 + $0x150] sm:$0xff]  ;;  %v687_v49 = vld [vmem:[#allocation4 + $0xc8] sm:$0xff]  ;;  %v686_v57 = vld [vmem:[#allocation4 + $0xc0] sm:$0xff] }
 0x1b5   :  { %1708 = vmatprep.subr.mxu0 %v722_v38  ;;  %1674 = vmatpush3.msra.mxu1 %v674_v39  ;;  %v719_v54 = vld [vmem:[#allocation4 + $0x1c8] sm:$0xff]  ;;  %v718_v58 = vld [vmem:[#allocation4 + $0x1c0] sm:$0xff]  ;;  %v685_v1 = vld [vmem:[#allocation4 + $0xb8] sm:$0xff] }
 0x1b6   :  { %1709 = vmatpush3.msra.mxu0 %v706_v40  ;;  %1675 = vmatprep.subr.mxu1 %v689_v41  ;;  %v671_v55 = vld [vmem:[#allocation4 + $0x48] sm:$0xff]  ;;  %v670_v59 = vld [vmem:[#allocation4 + $0x40] sm:$0xff]  ;;  %v717_v2 = vld [vmem:[#allocation4 + $0x1b8] sm:$0xff] }
 0x1b7   :  { %1710 = vmatprep.subr.mxu0 %v721_v42  ;;  %1676 = vmatpush3.msra.mxu1 %v673_v43  ;;  %v703_v56 = vld [vmem:[#allocation4 + $0x148] sm:$0xff]  ;;  %v702_v0 = vld [vmem:[#allocation4 + $0x140] sm:$0xff]  ;;  %v669_v3 = vld [vmem:[#allocation4 + $0x38] sm:$0xff] }
 0x1b8   :  { %1711 = vmatpush3.msra.mxu0 %v705_v44  ;;  %1677 = vmatprep.subr.mxu1 %v688_v45  ;;  %v701_v4 = vld [vmem:[#allocation4 + $0x138] sm:$0xff]  ;;  %v684_v5 = vld [vmem:[#allocation4 + $0xb0] sm:$0xff]  ;;  %v683_v9 = vld [vmem:[#allocation4 + $0xa8] sm:$0xff] }
 0x1b9   :  { %1712 = vmatprep.subr.mxu0 %v720_v46  ;;  %1678 = vmatpush3.msra.mxu1 %v672_v47  ;;  %v716_v6 = vld [vmem:[#allocation4 + $0x1b0] sm:$0xff]  ;;  %v715_v11 = vld [vmem:[#allocation4 + $0x1a8] sm:$0xff]  ;;  %v682_v14 = vld [vmem:[#allocation4 + $0xa0] sm:$0xff] }
 0x1ba   :  { %1713 = vmatpush3.msra.mxu0 %v704_v48  ;;  %1679 = vmatprep.subr.mxu1 %v687_v49  ;;  %v668_v7 = vld [vmem:[#allocation4 + $0x30] sm:$0xff]  ;;  %v667_v12 = vld [vmem:[#allocation4 + $0x28] sm:$0xff]  ;;  %v714_v15 = vld [vmem:[#allocation4 + $0x1a0] sm:$0xff] }
 0x1bb   :  { %1714 = vmatprep.subr.mxu0 %v719_v54  ;;  %1680 = vmatpush3.msra.mxu1 %v671_v55  ;;  %v700_v8 = vld [vmem:[#allocation4 + $0x130] sm:$0xff]  ;;  %v699_v13 = vld [vmem:[#allocation4 + $0x128] sm:$0xff]  ;;  %v666_v16 = vld [vmem:[#allocation4 + $0x20] sm:$0xff] }
 0x1bc   :  { %1715 = vmatpush3.msra.mxu0 %v703_v56  ;;  %1681 = vmatprep.subr.mxu1 %v686_v57  ;;  %v698_v18 = vld [vmem:[#allocation4 + $0x120] sm:$0xff]  ;;  %v681_v20 = vld [vmem:[#allocation4 + $0x98] sm:$0xff]  ;;  %v680_v28 = vld [vmem:[#allocation4 + $0x90] sm:$0xff] }
 0x1bd   :  { %1716 = vmatprep.subr.mxu0 %v718_v58  ;;  %1682 = vmatpush3.msra.mxu1 %v670_v59  ;;  %v713_v25 = vld [vmem:[#allocation4 + $0x198] sm:$0xff]  ;;  %v712_v29 = vld [vmem:[#allocation4 + $0x190] sm:$0xff]  ;;  %v679_v32 = vld [vmem:[#allocation4 + $0x88] sm:$0xff] }
 0x1be   :  { %1717 = vmatpush3.msra.mxu0 %v702_v0  ;;  %1683 = vmatprep.subr.mxu1 %v685_v1  ;;  %v665_v26 = vld [vmem:[#allocation4 + $0x18] sm:$0xff]  ;;  %v664_v30 = vld [vmem:[#allocation4 + $0x10] sm:$0xff]  ;;  %v711_v33 = vld [vmem:[#allocation4 + $0x188] sm:$0xff] }
 0x1bf   :  { %1718 = vmatprep.subr.mxu0 %v717_v2  ;;  %1684 = vmatpush3.msra.mxu1 %v669_v3  ;;  %v697_v27 = vld [vmem:[#allocation4 + $0x118] sm:$0xff]  ;;  %v696_v31 = vld [vmem:[#allocation4 + $0x110] sm:$0xff]  ;;  %v663_v34 = vld [vmem:[#allocation4 + $0x8] sm:$0xff] }
 0x1c0   :  { %1719 = vmatpush3.msra.mxu0 %v701_v4  ;;  %1685 = vmatprep.subr.mxu1 %v684_v5  ;;  %v695_v35 = vld [vmem:[#allocation4 + $0x108] sm:$0xff]  ;;  %v678_v36 = vld [vmem:[#allocation4 + $0x80] sm:$0xff]  ;;  %v757_v40 = vld [vmem:[#allocation4 + $0x2f8] sm:$0xff] }
 0x1c1   :  { %1720 = vmatprep.subr.mxu0 %v716_v6  ;;  %1686 = vmatpush3.msra.mxu1 %v668_v7  ;;  %v710_v37 = vld [vmem:[#allocation4 + $0x180] sm:$0xff]  ;;  %v789_v41 = vld [vmem:[#allocation4 + $0x3f8] sm:$0xff]  ;;  %v756_v44 = vld [vmem:[#allocation4 + $0x2f0] sm:$0xff] }
 0x1c2   :  { %1721 = vmatpush3.msra.mxu0 %v700_v8  ;;  %1687 = vmatprep.subr.mxu1 %v683_v9  ;;  %v662_v38 = vld [vmem:[#allocation4] sm:$0xff]  ;;  %v741_v42 = vld [vmem:[#allocation4 + $0x278] sm:$0xff]  ;;  %v788_v45 = vld [vmem:[#allocation4 + $0x3f0] sm:$0xff] }
 0x1c3   :  { %1722 = vmatprep.subr.mxu0 %v715_v11  ;;  %1688 = vmatpush3.msra.mxu1 %v667_v12  ;;  %v694_v39 = vld [vmem:[#allocation4 + $0x100] sm:$0xff]  ;;  %v773_v43 = vld [vmem:[#allocation4 + $0x378] sm:$0xff]  ;;  %v740_v46 = vld [vmem:[#allocation4 + $0x270] sm:$0xff] }
 0x1c4   :  { %1723 = vmatpush3.msra.mxu0 %v699_v13  ;;  %1689 = vmatprep.subr.mxu1 %v682_v14  ;;  %v772_v47 = vld [vmem:[#allocation4 + $0x370] sm:$0xff]  ;;  %v755_v48 = vld [vmem:[#allocation4 + $0x2e8] sm:$0xff]  ;;  %v754_v56 = vld [vmem:[#allocation4 + $0x2e0] sm:$0xff] }
 0x1c5   :  { %1724 = vmatprep.subr.mxu0 %v714_v15  ;;  %1690 = vmatpush3.msra.mxu1 %v666_v16  ;;  %v787_v49 = vld [vmem:[#allocation4 + $0x3e8] sm:$0xff]  ;;  %v738_v57 = vld [vmem:[#allocation4 + $0x260] sm:$0xff]  ;;  %v785_v59 = vld [vmem:[#allocation4 + $0x3d8] sm:$0xff] }
 0x1c6   :  { %1725 = vmatpush3.msra.mxu0 %v698_v18  ;;  %1691 = vmatprep.subr.mxu1 %v681_v20  ;;  %v739_v54 = vld [vmem:[#allocation4 + $0x268] sm:$0xff]  ;;  %v770_v58 = vld [vmem:[#allocation4 + $0x360] sm:$0xff]  ;;  %v737_v0 = vld [vmem:[#allocation4 + $0x258] sm:$0xff] }
 0x1c7   :  { %1726 = vmatprep.subr.mxu0 %v713_v25  ;;  %1692 = vmatpush3.msra.mxu1 %v665_v26  ;;  %v771_v55 = vld [vmem:[#allocation4 + $0x368] sm:$0xff]  ;;  %v769_v1 = vld [vmem:[#allocation4 + $0x358] sm:$0xff]  ;;  %v752_v2 = vld [vmem:[#allocation4 + $0x2d0] sm:$0xff] }
 0x1c8   :  { %1727 = vmatpush3.msra.mxu0 %v697_v27  ;;  %1693 = vmatprep.subr.mxu1 %v680_v28  ;;  %v784_v3 = vld [vmem:[#allocation4 + $0x3d0] sm:$0xff]  ;;  %v751_v6 = vld [vmem:[#allocation4 + $0x2c8] sm:$0xff]  ;;  %v750_v11 = vld [vmem:[#allocation4 + $0x2c0] sm:$0xff] }
 0x1c9   :  { %1728 = vmatprep.subr.mxu0 %v712_v29  ;;  %1694 = vmatpush3.msra.mxu1 %v664_v30  ;;  %v736_v4 = vld [vmem:[#allocation4 + $0x250] sm:$0xff]  ;;  %v783_v7 = vld [vmem:[#allocation4 + $0x3c8] sm:$0xff]  ;;  %v782_v12 = vld [vmem:[#allocation4 + $0x3c0] sm:$0xff] }
 0x1ca   :  { %1729 = vmatpush3.msra.mxu0 %v696_v31  ;;  %1695 = vmatprep.subr.mxu1 %v679_v32  ;;  %v768_v5 = vld [vmem:[#allocation4 + $0x350] sm:$0xff]  ;;  %v735_v8 = vld [vmem:[#allocation4 + $0x248] sm:$0xff]  ;;  %v734_v13 = vld [vmem:[#allocation4 + $0x240] sm:$0xff] }
 0x1cb   :  { %1730 = vmatprep.subr.mxu0 %v711_v33  ;;  %1696 = vmatpush3.msra.mxu1 %v663_v34  ;;  %v767_v9 = vld [vmem:[#allocation4 + $0x348] sm:$0xff]  ;;  %v766_v14 = vld [vmem:[#allocation4 + $0x340] sm:$0xff]  ;;  %v749_v15 = vld [vmem:[#allocation4 + $0x2b8] sm:$0xff] }
 0x1cc   :  { %1731 = vmatpush3.msra.mxu0 %v695_v35  ;;  %1697 = vmatprep.subr.mxu1 %v678_v36  ;;  %v781_v16 = vld [vmem:[#allocation4 + $0x3b8] sm:$0xff]  ;;  %v748_v25 = vld [vmem:[#allocation4 + $0x2b0] sm:$0xff]  ;;  %v747_v29 = vld [vmem:[#allocation4 + $0x2a8] sm:$0xff] }
 0x1cd   :  { %1732 = vmatprep.subr.mxu0 %v710_v37  ;;  %1698 = vmatpush3.msra.mxu1 %v662_v38  ;;  %v733_v18 = vld [vmem:[#allocation4 + $0x238] sm:$0xff]  ;;  %v780_v26 = vld [vmem:[#allocation4 + $0x3b0] sm:$0xff]  ;;  %v779_v30 = vld [vmem:[#allocation4 + $0x3a8] sm:$0xff] }
 0x1ce   :  { %1733 = vmatpush3.msra.mxu0 %v694_v39  ;;  %990 = vmatmul.mubr.f32.vlgmr.msra.gmra.mxu1 %v2371_v17  ;;  %v786_v17 = vld [vmem:[#allocation4 + $0x3e0] sm:$0xff]  ;;  %v765_v20 = vld [vmem:[#allocation4 + $0x338] sm:$0xff]  ;;  %v732_v27 = vld [vmem:[#allocation4 + $0x230] sm:$0xff] }
 0x1cf   :  { %1737 = vmatprep.subr.mxu1 %v757_v40  ;;  %1772 = vmatprep.subr.mxu0 %v789_v41  ;;  %v764_v28 = vld [vmem:[#allocation4 + $0x330] sm:$0xff]  ;;  %v731_v31 = vld [vmem:[#allocation4 + $0x228] sm:$0xff]  ;;  %v746_v33 = vld [vmem:[#allocation4 + $0x2a0] sm:$0xff] }
 0x1d0   :  { %1060 = vmatmul.mubr.f32.vlgmr.msra.gmra.mxu0 %v2375_v19  ;;  %1738 = vmatpush3.msra.mxu1 %v741_v42  ;;  %v753_v19 = vld [vmem:[#allocation4 + $0x2d8] sm:$0xff]  ;;  %v763_v32 = vld [vmem:[#allocation4 + $0x328] sm:$0xff]  ;;  %v778_v34 = vld [vmem:[#allocation4 + $0x3a0] sm:$0xff] }
 0x1d1   :  { %1773 = vmatpush3.msra.mxu0 %v773_v43  ;;  %1739 = vmatprep.subr.mxu1 %v756_v44  ;;  %v730_v35 = vld [vmem:[#allocation4 + $0x220] sm:$0xff]  ;;  %v745_v37 = vld [vmem:[#allocation4 + $0x298] sm:$0xff]  ;;  %v744_v41 = vld [vmem:[#allocation4 + $0x290] sm:$0xff] }
 0x1d2   :  { %1774 = vmatprep.subr.mxu0 %v788_v45  ;;  %1740 = vmatpush3.msra.mxu1 %v740_v46  ;;  %v762_v36 = vld [vmem:[#allocation4 + $0x320] sm:$0xff]  ;;  %v777_v38 = vld [vmem:[#allocation4 + $0x398] sm:$0xff]  ;;  %v776_v42 = vld [vmem:[#allocation4 + $0x390] sm:$0xff] }
 0x1d3   :  { %1775 = vmatpush3.msra.mxu0 %v772_v47  ;;  %1741 = vmatprep.subr.mxu1 %v755_v48  ;;  %v729_v39 = vld [vmem:[#allocation4 + $0x218] sm:$0xff]  ;;  %v728_v43 = vld [vmem:[#allocation4 + $0x210] sm:$0xff]  ;;  %v743_v45 = vld [vmem:[#allocation4 + $0x288] sm:$0xff] }
 0x1d4   :  { %1776 = vmatprep.subr.mxu0 %v787_v49  ;;  %1742 = vmatpush3.msra.mxu1 %v739_v54  ;;  %v761_v40 = vld [vmem:[#allocation4 + $0x318] sm:$0xff]  ;;  %v760_v44 = vld [vmem:[#allocation4 + $0x310] sm:$0xff]  ;;  %v775_v46 = vld [vmem:[#allocation4 + $0x388] sm:$0xff] }
 0x1d5   :  { %1777 = vmatpush3.msra.mxu0 %v771_v55  ;;  %1743 = vmatprep.subr.mxu1 %v754_v56  ;;  %v727_v47 = vld [vmem:[#allocation4 + $0x208] sm:$0xff]  ;;  %v742_v49 = vld [vmem:[#allocation4 + $0x280] sm:$0xff] }
 0x1d6   :  { %1778 = vmatprep.subr.mxu0 %v786_v17  ;;  %1744 = vmatpush3.msra.mxu1 %v738_v57  ;;  %v759_v48 = vld [vmem:[#allocation4 + $0x308] sm:$0xff]  ;;  %v774_v54 = vld [vmem:[#allocation4 + $0x380] sm:$0xff]  ;;  %v821_v17 = vld [vmem:[#allocation4 + $0x4f8] sm:$0xff] }
 0x1d7   :  { %1779 = vmatpush3.msra.mxu0 %v770_v58  ;;  %1745 = vmatprep.subr.mxu1 %v753_v19  ;;  %v726_v55 = vld [vmem:[#allocation4 + $0x200] sm:$0xff]  ;;  %v853_v57 = vld [vmem:[#allocation4 + $0x5f8] sm:$0xff] }
 0x1d8   :  { %1780 = vmatprep.subr.mxu0 %v785_v59  ;;  %1746 = vmatpush3.msra.mxu1 %v737_v0  ;;  %v758_v56 = vld [vmem:[#allocation4 + $0x300] sm:$0xff]  ;;  %v805_v58 = vld [vmem:[#allocation4 + $0x478] sm:$0xff]  ;;  %v820_v59 = vld [vmem:[#allocation4 + $0x4f0] sm:$0xff] }
 0x1d9   :  { %1781 = vmatpush3.msra.mxu0 %v769_v1  ;;  %1747 = vmatprep.subr.mxu1 %v752_v2  ;;  %v837_v19 = vld [vmem:[#allocation4 + $0x578] sm:$0xff]  ;;  %v852_v0 = vld [vmem:[#allocation4 + $0x5f0] sm:$0xff] }
 0x1da   :  { %1782 = vmatprep.subr.mxu0 %v784_v3  ;;  %1748 = vmatpush3.msra.mxu1 %v736_v4  ;;  %v804_v1 = vld [vmem:[#allocation4 + $0x470] sm:$0xff]  ;;  %v819_v3 = vld [vmem:[#allocation4 + $0x4e8] sm:$0xff] }
 0x1db   :  { %1783 = vmatpush3.msra.mxu0 %v768_v5  ;;  %1749 = vmatprep.subr.mxu1 %v751_v6  ;;  %v836_v2 = vld [vmem:[#allocation4 + $0x570] sm:$0xff]  ;;  %v803_v4 = vld [vmem:[#allocation4 + $0x468] sm:$0xff]  ;;  %v818_v5 = vld [vmem:[#allocation4 + $0x4e0] sm:$0xff] }
 0x1dc   :  { %1784 = vmatprep.subr.mxu0 %v783_v7  ;;  %1750 = vmatpush3.msra.mxu1 %v735_v8  ;;  %v802_v6 = vld [vmem:[#allocation4 + $0x460] sm:$0xff]  ;;  %v849_v8 = vld [vmem:[#allocation4 + $0x5d8] sm:$0xff] }
 0x1dd   :  { %1785 = vmatpush3.msra.mxu0 %v767_v9  ;;  %1751 = vmatprep.subr.mxu1 %v750_v11  ;;  %v834_v7 = vld [vmem:[#allocation4 + $0x560] sm:$0xff]  ;;  %v801_v9 = vld [vmem:[#allocation4 + $0x458] sm:$0xff] }
 0x1de   :  { %1786 = vmatprep.subr.mxu0 %v782_v12  ;;  %1752 = vmatpush3.msra.mxu1 %v734_v13  ;;  %v833_v11 = vld [vmem:[#allocation4 + $0x558] sm:$0xff]  ;;  %v816_v12 = vld [vmem:[#allocation4 + $0x4d0] sm:$0xff] }
 0x1df   :  { %1787 = vmatpush3.msra.mxu0 %v766_v14  ;;  %1753 = vmatprep.subr.mxu1 %v749_v15  ;;  %v848_v13 = vld [vmem:[#allocation4 + $0x5d0] sm:$0xff] }
 0x1e0   :  { %1788 = vmatprep.subr.mxu0 %v781_v16  ;;  %1754 = vmatpush3.msra.mxu1 %v733_v18  ;;  %v800_v14 = vld [vmem:[#allocation4 + $0x450] sm:$0xff]  ;;  %v815_v16 = vld [vmem:[#allocation4 + $0x4c8] sm:$0xff] }
 0x1e1   :  { %1789 = vmatpush3.msra.mxu0 %v765_v20  ;;  %1755 = vmatprep.subr.mxu1 %v748_v25  ;;  %v832_v15 = vld [vmem:[#allocation4 + $0x550] sm:$0xff]  ;;  %v847_v18 = vld [vmem:[#allocation4 + $0x5c8] sm:$0xff] }
 0x1e2   :  { %1790 = vmatprep.subr.mxu0 %v780_v26  ;;  %1756 = vmatpush3.msra.mxu1 %v732_v27  ;;  %v799_v20 = vld [vmem:[#allocation4 + $0x448] sm:$0xff]  ;;  %v814_v26 = vld [vmem:[#allocation4 + $0x4c0] sm:$0xff] }
 0x1e3   :  { %1791 = vmatpush3.msra.mxu0 %v764_v28  ;;  %1757 = vmatprep.subr.mxu1 %v747_v29  ;;  %v831_v25 = vld [vmem:[#allocation4 + $0x548] sm:$0xff]  ;;  %v846_v27 = vld [vmem:[#allocation4 + $0x5c0] sm:$0xff] }
 0x1e4   :  { %1792 = vmatprep.subr.mxu0 %v779_v30  ;;  %1758 = vmatpush3.msra.mxu1 %v731_v31  ;;  %v798_v28 = vld [vmem:[#allocation4 + $0x440] sm:$0xff]  ;;  %v813_v30 = vld [vmem:[#allocation4 + $0x4b8] sm:$0xff] }
 0x1e5   :  { %1793 = vmatpush3.msra.mxu0 %v763_v32  ;;  %1759 = vmatprep.subr.mxu1 %v746_v33  ;;  %v830_v29 = vld [vmem:[#allocation4 + $0x540] sm:$0xff]  ;;  %v845_v31 = vld [vmem:[#allocation4 + $0x5b8] sm:$0xff] }
 0x1e6   :  { %1794 = vmatprep.subr.mxu0 %v778_v34  ;;  %1760 = vmatpush3.msra.mxu1 %v730_v35  ;;  %v797_v32 = vld [vmem:[#allocation4 + $0x438] sm:$0xff]  ;;  %v812_v34 = vld [vmem:[#allocation4 + $0x4b0] sm:$0xff] }
 0x1e7   :  { %1795 = vmatpush3.msra.mxu0 %v762_v36  ;;  %1761 = vmatprep.subr.mxu1 %v745_v37  ;;  %v829_v33 = vld [vmem:[#allocation4 + $0x538] sm:$0xff]  ;;  %v844_v35 = vld [vmem:[#allocation4 + $0x5b0] sm:$0xff] }
 0x1e8   :  { %1796 = vmatprep.subr.mxu0 %v777_v38  ;;  %1762 = vmatpush3.msra.mxu1 %v729_v39  ;;  %v796_v36 = vld [vmem:[#allocation4 + $0x430] sm:$0xff]  ;;  %v811_v38 = vld [vmem:[#allocation4 + $0x4a8] sm:$0xff] }
 0x1e9   :  { %1797 = vmatpush3.msra.mxu0 %v761_v40  ;;  %1763 = vmatprep.subr.mxu1 %v744_v41  ;;  %v828_v37 = vld [vmem:[#allocation4 + $0x530] sm:$0xff]  ;;  %v843_v39 = vld [vmem:[#allocation4 + $0x5a8] sm:$0xff] }
 0x1ea   :  { %1798 = vmatprep.subr.mxu0 %v776_v42  ;;  %1764 = vmatpush3.msra.mxu1 %v728_v43  ;;  %v795_v40 = vld [vmem:[#allocation4 + $0x428] sm:$0xff]  ;;  %v810_v42 = vld [vmem:[#allocation4 + $0x4a0] sm:$0xff] }
 0x1eb   :  { %1799 = vmatpush3.msra.mxu0 %v760_v44  ;;  %1765 = vmatprep.subr.mxu1 %v743_v45  ;;  %v827_v41 = vld [vmem:[#allocation4 + $0x528] sm:$0xff]  ;;  %v842_v43 = vld [vmem:[#allocation4 + $0x5a0] sm:$0xff] }
 0x1ec   :  { %1800 = vmatprep.subr.mxu0 %v775_v46  ;;  %1766 = vmatpush3.msra.mxu1 %v727_v47  ;;  %v794_v44 = vld [vmem:[#allocation4 + $0x420] sm:$0xff]  ;;  %v809_v46 = vld [vmem:[#allocation4 + $0x498] sm:$0xff] }
 0x1ed   :  { %1801 = vmatpush3.msra.mxu0 %v759_v48  ;;  %1767 = vmatprep.subr.mxu1 %v742_v49  ;;  %v826_v45 = vld [vmem:[#allocation4 + $0x520] sm:$0xff]  ;;  %v841_v47 = vld [vmem:[#allocation4 + $0x598] sm:$0xff] }
 0x1ee   :  { %1802 = vmatprep.subr.mxu0 %v774_v54  ;;  %1768 = vmatpush3.msra.mxu1 %v726_v55  ;;  %v793_v48 = vld [vmem:[#allocation4 + $0x418] sm:$0xff]  ;;  %v808_v54 = vld [vmem:[#allocation4 + $0x490] sm:$0xff] }
 0x1ef   :  { %1129 = vmatprep.mubr.f32.mxu1 %v2382_v22  ;;  %1803 = vmatpush3.msra.mxu0 %v758_v56  ;;  %v851_v22 = vld [vmem:[#allocation4 + $0x5e8] sm:$0xff]  ;;  %v825_v49 = vld [vmem:[#allocation4 + $0x518] sm:$0xff]  ;;  %v840_v55 = vld [vmem:[#allocation4 + $0x590] sm:$0xff] }
 0x1f0   :  { %1130 = vmatmul.mubr.f32.vlgmr.msra.gmra.mxu1 %v2379_v21  ;;  %1199 = vmatprep.mubr.f32.mxu0 %v2388_v24  ;;  %v835_v21 = vld [vmem:[#allocation4 + $0x568] sm:$0xff]  ;;  %v850_v24 = vld [vmem:[#allocation4 + $0x5e0] sm:$0xff]  ;;  %v792_v56 = vld [vmem:[#allocation4 + $0x410] sm:$0xff] }
 0x1f1   :  { %1807 = vmatprep.subr.mxu1 %v821_v17  ;;  %1842 = vmatprep.subr.mxu0 %v853_v57  ;;  %v824_v17 = vld [vmem:[#allocation4 + $0x510] sm:$0xff]  ;;  %v807_v57 = vld [vmem:[#allocation4 + $0x488] sm:$0xff] }
 0x1f2   :  { %1200 = vmatmul.mubr.f32.vlgmr.msra.gmra.mxu0 %v2385_v23  ;;  %1808 = vmatpush3.msra.mxu1 %v805_v58  ;;  %v817_v23 = vld [vmem:[#allocation4 + $0x4d8] sm:$0xff]  ;;  %v839_v58 = vld [vmem:[#allocation4 + $0x588] sm:$0xff] }
 0x1f3   :  { %1843 = vmatpush3.msra.mxu0 %v837_v19  ;;  %1809 = vmatprep.subr.mxu1 %v820_v59  ;;  %v791_v19 = vld [vmem:[#allocation4 + $0x408] sm:$0xff] }
 0x1f4   :  { %1844 = vmatprep.subr.mxu0 %v852_v0  ;;  %1810 = vmatpush3.msra.mxu1 %v804_v1  ;;  %v823_v59 = vld [vmem:[#allocation4 + $0x508] sm:$0xff]  ;;  %v806_v0 = vld [vmem:[#allocation4 + $0x480] sm:$0xff] }
 0x1f5   :  { %1845 = vmatpush3.msra.mxu0 %v836_v2  ;;  %1811 = vmatprep.subr.mxu1 %v819_v3  ;;  %v838_v1 = vld [vmem:[#allocation4 + $0x580] sm:$0xff] }
 0x1f6   :  { %1846 = vmatprep.subr.mxu0 %v851_v22  ;;  %1812 = vmatpush3.msra.mxu1 %v803_v4  ;;  %v790_v2 = vld [vmem:[#allocation4 + $0x400] sm:$0xff]  ;;  %v885_v22 = vld [vmem:[#allocation4 + $0x6f8] sm:$0xff] }
 0x1f7   :  { %1847 = vmatpush3.msra.mxu0 %v835_v21  ;;  %1813 = vmatprep.subr.mxu1 %v818_v5  ;;  %v822_v3 = vld [vmem:[#allocation4 + $0x500] sm:$0xff]  ;;  %v917_v4 = vld [vmem:[#allocation4 + $0x7f8] sm:$0xff] }
 0x1f8   :  { %1848 = vmatprep.subr.mxu0 %v850_v24  ;;  %1814 = vmatpush3.msra.mxu1 %v802_v6  ;;  %v869_v21 = vld [vmem:[#allocation4 + $0x678] sm:$0xff]  ;;  %v884_v24 = vld [vmem:[#allocation4 + $0x6f0] sm:$0xff] }
 0x1f9   :  { %1849 = vmatpush3.msra.mxu0 %v834_v7  ;;  %1815 = vmatprep.subr.mxu1 %v817_v23  ;;  %v901_v5 = vld [vmem:[#allocation4 + $0x778] sm:$0xff]  ;;  %v916_v6 = vld [vmem:[#allocation4 + $0x7f0] sm:$0xff] }
 0x1fa   :  { %1850 = vmatprep.subr.mxu0 %v849_v8  ;;  %1816 = vmatpush3.msra.mxu1 %v801_v9  ;;  %v868_v7 = vld [vmem:[#allocation4 + $0x670] sm:$0xff]  ;;  %v883_v8 = vld [vmem:[#allocation4 + $0x6e8] sm:$0xff] }
 0x1fb   :  { %1851 = vmatpush3.msra.mxu0 %v833_v11  ;;  %1817 = vmatprep.subr.mxu1 %v816_v12  ;;  %v900_v23 = vld [vmem:[#allocation4 + $0x770] sm:$0xff]  ;;  %v867_v9 = vld [vmem:[#allocation4 + $0x668] sm:$0xff]  ;;  %v882_v11 = vld [vmem:[#allocation4 + $0x6e0] sm:$0xff] }
 0x1fc   :  { %1852 = vmatprep.subr.mxu0 %v848_v13  ;;  %1818 = vmatpush3.msra.mxu1 %v800_v14  ;;  %v866_v12 = vld [vmem:[#allocation4 + $0x660] sm:$0xff]  ;;  %v913_v14 = vld [vmem:[#allocation4 + $0x7d8] sm:$0xff] }
 0x1fd   :  { %1853 = vmatpush3.msra.mxu0 %v832_v15  ;;  %1819 = vmatprep.subr.mxu1 %v815_v16  ;;  %v898_v13 = vld [vmem:[#allocation4 + $0x760] sm:$0xff]  ;;  %v865_v15 = vld [vmem:[#allocation4 + $0x658] sm:$0xff] }
 0x1fe   :  { %1854 = vmatprep.subr.mxu0 %v847_v18  ;;  %1820 = vmatpush3.msra.mxu1 %v799_v20  ;;  %v897_v16 = vld [vmem:[#allocation4 + $0x758] sm:$0xff]  ;;  %v880_v18 = vld [vmem:[#allocation4 + $0x6d0] sm:$0xff] }
 0x1ff   :  { %1855 = vmatpush3.msra.mxu0 %v831_v25  ;;  %1821 = vmatprep.subr.mxu1 %v814_v26  ;;  %v912_v20 = vld [vmem:[#allocation4 + $0x7d0] sm:$0xff] }
 0x200   :  { %1856 = vmatprep.subr.mxu0 %v846_v27  ;;  %1822 = vmatpush3.msra.mxu1 %v798_v28  ;;  %v864_v25 = vld [vmem:[#allocation4 + $0x650] sm:$0xff]  ;;  %v879_v27 = vld [vmem:[#allocation4 + $0x6c8] sm:$0xff] }
 0x201   :  { %1857 = vmatpush3.msra.mxu0 %v830_v29  ;;  %1823 = vmatprep.subr.mxu1 %v813_v30  ;;  %v896_v26 = vld [vmem:[#allocation4 + $0x750] sm:$0xff]  ;;  %v911_v28 = vld [vmem:[#allocation4 + $0x7c8] sm:$0xff] }
 0x202   :  { %1858 = vmatprep.subr.mxu0 %v845_v31  ;;  %1824 = vmatpush3.msra.mxu1 %v797_v32  ;;  %v863_v29 = vld [vmem:[#allocation4 + $0x648] sm:$0xff]  ;;  %v878_v31 = vld [vmem:[#allocation4 + $0x6c0] sm:$0xff] }
 0x203   :  { %1859 = vmatpush3.msra.mxu0 %v829_v33  ;;  %1825 = vmatprep.subr.mxu1 %v812_v34  ;;  %v895_v30 = vld [vmem:[#allocation4 + $0x748] sm:$0xff]  ;;  %v910_v32 = vld [vmem:[#allocation4 + $0x7c0] sm:$0xff] }
 0x204   :  { %1860 = vmatprep.subr.mxu0 %v844_v35  ;;  %1826 = vmatpush3.msra.mxu1 %v796_v36  ;;  %v862_v33 = vld [vmem:[#allocation4 + $0x640] sm:$0xff]  ;;  %v877_v35 = vld [vmem:[#allocation4 + $0x6b8] sm:$0xff] }
 0x205   :  { %1861 = vmatpush3.msra.mxu0 %v828_v37  ;;  %1827 = vmatprep.subr.mxu1 %v811_v38  ;;  %v894_v34 = vld [vmem:[#allocation4 + $0x740] sm:$0xff]  ;;  %v909_v36 = vld [vmem:[#allocation4 + $0x7b8] sm:$0xff] }
 0x206   :  { %1862 = vmatprep.subr.mxu0 %v843_v39  ;;  %1828 = vmatpush3.msra.mxu1 %v795_v40  ;;  %v861_v37 = vld [vmem:[#allocation4 + $0x638] sm:$0xff]  ;;  %v876_v39 = vld [vmem:[#allocation4 + $0x6b0] sm:$0xff] }
 0x207   :  { %1863 = vmatpush3.msra.mxu0 %v827_v41  ;;  %1829 = vmatprep.subr.mxu1 %v810_v42  ;;  %v893_v38 = vld [vmem:[#allocation4 + $0x738] sm:$0xff]  ;;  %v908_v40 = vld [vmem:[#allocation4 + $0x7b0] sm:$0xff] }
 0x208   :  { %1864 = vmatprep.subr.mxu0 %v842_v43  ;;  %1830 = vmatpush3.msra.mxu1 %v794_v44  ;;  %v860_v41 = vld [vmem:[#allocation4 + $0x630] sm:$0xff]  ;;  %v875_v43 = vld [vmem:[#allocation4 + $0x6a8] sm:$0xff] }
 0x209   :  { %1865 = vmatpush3.msra.mxu0 %v826_v45  ;;  %1831 = vmatprep.subr.mxu1 %v809_v46  ;;  %v892_v42 = vld [vmem:[#allocation4 + $0x730] sm:$0xff]  ;;  %v907_v44 = vld [vmem:[#allocation4 + $0x7a8] sm:$0xff] }
 0x20a   :  { %1866 = vmatprep.subr.mxu0 %v841_v47  ;;  %1832 = vmatpush3.msra.mxu1 %v793_v48  ;;  %v859_v45 = vld [vmem:[#allocation4 + $0x628] sm:$0xff]  ;;  %v874_v47 = vld [vmem:[#allocation4 + $0x6a0] sm:$0xff] }
 0x20b   :  { %1867 = vmatpush3.msra.mxu0 %v825_v49  ;;  %1833 = vmatprep.subr.mxu1 %v808_v54  ;;  %v891_v46 = vld [vmem:[#allocation4 + $0x728] sm:$0xff]  ;;  %v906_v48 = vld [vmem:[#allocation4 + $0x7a0] sm:$0xff] }
 0x20c   :  { %1868 = vmatprep.subr.mxu0 %v840_v55  ;;  %1834 = vmatpush3.msra.mxu1 %v792_v56  ;;  %v858_v49 = vld [vmem:[#allocation4 + $0x620] sm:$0xff]  ;;  %v873_v55 = vld [vmem:[#allocation4 + $0x698] sm:$0xff] }
 0x20d   :  { %1869 = vmatpush3.msra.mxu0 %v824_v17  ;;  %1835 = vmatprep.subr.mxu1 %v807_v57  ;;  %v890_v54 = vld [vmem:[#allocation4 + $0x720] sm:$0xff]  ;;  %v905_v56 = vld [vmem:[#allocation4 + $0x798] sm:$0xff] }
 0x20e   :  { %1870 = vmatprep.subr.mxu0 %v839_v58  ;;  %1836 = vmatpush3.msra.mxu1 %v791_v19  ;;  %v857_v17 = vld [vmem:[#allocation4 + $0x618] sm:$0xff]  ;;  %v872_v58 = vld [vmem:[#allocation4 + $0x690] sm:$0xff] }
 0x20f   :  { %1871 = vmatpush3.msra.mxu0 %v823_v59  ;;  %1837 = vmatprep.subr.mxu1 %v806_v0  ;;  %v889_v57 = vld [vmem:[#allocation4 + $0x718] sm:$0xff]  ;;  %v904_v19 = vld [vmem:[#allocation4 + $0x790] sm:$0xff] }
 0x210   :  { %1872 = vmatprep.subr.mxu0 %v838_v1  ;;  %1838 = vmatpush3.msra.mxu1 %v790_v2  ;;  %v856_v59 = vld [vmem:[#allocation4 + $0x610] sm:$0xff]  ;;  %v871_v1 = vld [vmem:[#allocation4 + $0x688] sm:$0xff] }
 0x211   :  { %1269 = vmatprep.mubr.f32.mxu1 %v2350_v51  ;;  %1873 = vmatpush3.msra.mxu0 %v822_v3  ;;  %v915_v51 = vld [vmem:[#allocation4 + $0x7e8] sm:$0xff]  ;;  %v888_v0 = vld [vmem:[#allocation4 + $0x710] sm:$0xff] }
 0x212   :  { %1270 = vmatmul.mubr.f32.vlgmr.msra.gmra.mxu1 %v2347_v50  ;;  %1339 = vmatprep.mubr.f32.mxu0 %v2356_v53  ;;  %v899_v50 = vld [vmem:[#allocation4 + $0x768] sm:$0xff]  ;;  %v914_v53 = vld [vmem:[#allocation4 + $0x7e0] sm:$0xff] }
 0x213   :  { %1877 = vmatprep.subr.mxu1 %v885_v22  ;;  %1912 = vmatprep.subr.mxu0 %v917_v4  ;;  %v903_v2 = vld [vmem:[#allocation4 + $0x788] sm:$0xff]  ;;  %v870_v4 = vld [vmem:[#allocation4 + $0x680] sm:$0xff] }
 0x214   :  { %1340 = vmatmul.mubr.f32.vlgmr.msra.gmra.mxu0 %v2353_v52  ;;  %1878 = vmatpush3.msra.mxu1 %v869_v21  ;;  %v881_v52 = vld [vmem:[#allocation4 + $0x6d8] sm:$0xff]  ;;  %v855_v3 = vld [vmem:[#allocation4 + $0x608] sm:$0xff]  ;;  %v902_v21 = vld [vmem:[#allocation4 + $0x780] sm:$0xff] }
 0x215   :  { %1913 = vmatpush3.msra.mxu0 %v901_v5  ;;  %1879 = vmatprep.subr.mxu1 %v884_v24  ;;  %v887_v22 = vld [vmem:[#allocation4 + $0x708] sm:$0xff]  ;;  %v854_v5 = vld [vmem:[#allocation4 + $0x600] sm:$0xff] }
 0x216   :  { %1914 = vmatprep.subr.mxu0 %v916_v6  ;;  %1880 = vmatpush3.msra.mxu1 %v868_v7  ;;  %v886_v24 = vld [vmem:[#allocation4 + $0x700] sm:$0xff]  ;;  %v1489_v6 = vld [vmem:[#allocation13 + $0x18] sm:$0xff]  ;;  %v1488_v7 = vld [vmem:[#allocation13 + $0x10] sm:$0xff] }
 0x217   :  { %1915 = vmatpush3.msra.mxu0 %v900_v23  ;;  %1881 = vmatprep.subr.mxu1 %v883_v8  ;;  %v1487_v23 = vld [vmem:[#allocation13 + $0x8] sm:$0xff] }
 0x218   :  { %1916 = vmatprep.subr.mxu0 %v915_v51  ;;  %1882 = vmatpush3.msra.mxu1 %v867_v9  ;;  %v1603_v9 = vld [vmem:[%s2424_s5] ss:$0 sm:$0xff] }
 0x219   :  { %1917 = vmatpush3.msra.mxu0 %v899_v50  ;;  %1883 = vmatprep.subr.mxu1 %v882_v11 }
 0x21a   :  { %1918 = vmatprep.subr.mxu0 %v914_v53  ;;  %1884 = vmatpush3.msra.mxu1 %v866_v12 }
 0x21b   :  { %1919 = vmatpush3.msra.mxu0 %v898_v13  ;;  %1885 = vmatprep.subr.mxu1 %v881_v52 }
 0x21c   :  { %1920 = vmatprep.subr.mxu0 %v913_v14  ;;  %1886 = vmatpush3.msra.mxu1 %v865_v15 }
 0x21d   :  { %1921 = vmatpush3.msra.mxu0 %v897_v16  ;;  %1887 = vmatprep.subr.mxu1 %v880_v18 }
 0x21e   :  { %1922 = vmatprep.subr.mxu0 %v912_v20  ;;  %1888 = vmatpush3.msra.mxu1 %v864_v25 }
 0x21f   :  { %1923 = vmatpush3.msra.mxu0 %v896_v26  ;;  %1889 = vmatprep.subr.mxu1 %v879_v27 }
 0x220   :  { %1924 = vmatprep.subr.mxu0 %v911_v28  ;;  %1890 = vmatpush3.msra.mxu1 %v863_v29 }
 0x221   :  { %1925 = vmatpush3.msra.mxu0 %v895_v30  ;;  %1891 = vmatprep.subr.mxu1 %v878_v31 }
 0x222   :  { %1926 = vmatprep.subr.mxu0 %v910_v32  ;;  %1892 = vmatpush3.msra.mxu1 %v862_v33 }
 0x223   :  { %1927 = vmatpush3.msra.mxu0 %v894_v34  ;;  %1893 = vmatprep.subr.mxu1 %v877_v35 }
 0x224   :  { %1928 = vmatprep.subr.mxu0 %v909_v36  ;;  %1894 = vmatpush3.msra.mxu1 %v861_v37 }
 0x225   :  { %1929 = vmatpush3.msra.mxu0 %v893_v38  ;;  %1895 = vmatprep.subr.mxu1 %v876_v39 }
 0x226   :  { %1930 = vmatprep.subr.mxu0 %v908_v40  ;;  %1896 = vmatpush3.msra.mxu1 %v860_v41  ;;  %v1604_v41 = vld [vmem:[%s2426_s7] ss:$0 sm:$0xff] }
 0x227   :  { %1931 = vmatpush3.msra.mxu0 %v892_v42  ;;  %1897 = vmatprep.subr.mxu1 %v875_v43 }
 0x228   :  { %1932 = vmatprep.subr.mxu0 %v907_v44  ;;  %1898 = vmatpush3.msra.mxu1 %v859_v45 }
 0x229   :  { %1933 = vmatpush3.msra.mxu0 %v891_v46  ;;  %1899 = vmatprep.subr.mxu1 %v874_v47 }
 0x22a   :  { %1934 = vmatprep.subr.mxu0 %v906_v48  ;;  %1900 = vmatpush3.msra.mxu1 %v858_v49 }
 0x22b   :  { %1935 = vmatpush3.msra.mxu0 %v890_v54  ;;  %1901 = vmatprep.subr.mxu1 %v873_v55 }
 0x22c   :  { %1936 = vmatprep.subr.mxu0 %v905_v56  ;;  %1902 = vmatpush3.msra.mxu1 %v857_v17 }
 0x22d   :  { %1937 = vmatpush3.msra.mxu0 %v889_v57  ;;  %1903 = vmatprep.subr.mxu1 %v872_v58 }
 0x22e   :  { %1938 = vmatprep.subr.mxu0 %v904_v19  ;;  %1904 = vmatpush3.msra.mxu1 %v856_v59 }
 0x22f   :  { %1939 = vmatpush3.msra.mxu0 %v888_v0  ;;  %1905 = vmatprep.subr.mxu1 %v871_v1 }
 0x230   :  { %1940 = vmatprep.subr.mxu0 %v903_v2  ;;  %1906 = vmatpush3.msra.mxu1 %v855_v3 }
 0x231   :  { %1941 = vmatpush3.msra.mxu0 %v887_v22  ;;  %1907 = vmatprep.subr.mxu1 %v870_v4 }
 0x232   :  { %1942 = vmatprep.subr.mxu0 %v902_v21  ;;  %1908 = vmatpush3.msra.mxu1 %v854_v5 }
 0x233   :  { %1409 = vmatprep.mubr.f32.mxu1 %v2362_v61  ;;  %1943 = vmatpush3.msra.mxu0 %v886_v24  ;;  %v1486_v61 = vld [vmem:[#allocation13] sm:$0xff] }
 0x234   :  { %1479 = vmatprep.mubr.f32.mxu0 %v2368_v63  ;;  %1410 = vmatmul.mubr.f32.vlgmr.msra.gmra.mxu1 %v2359_v60 }
 0x235   :  { %1480 = vmatmul.mubr.f32.vlgmr.msra.gmra.mxu0 %v2365_v62  ;;  %2066 = vmatprep.subr.mxu1 %v2216_v10 }
 0x236   :  { %2067 = vmatpush3.msra.mxu1 %v1489_v6  ;;  %2074 = vmatprep.mubr.msk.f32.mxu1 %vm2219_vm8, %v2216_v10 }
 0x237   :  { %2068 = vmatprep.subr.mxu1 %v2216_v10 }
 0x238   :  { %2069 = vmatpush3.msra.mxu1 %v1488_v7 }
 0x239   :  { %2070 = vmatprep.subr.mxu1 %v2216_v10 }
 0x23a   :  { %2071 = vmatpush3.msra.mxu1 %v1487_v23 }
 0x23b   :  { %2072 = vmatprep.subr.mxu1 %v2216_v10 }
 0x23c   :  { %2073 = vmatpush3.msra.mxu1 %v1486_v61 }
 0x28e   :  { %v1699_v60 = vpop.f32.mrf.mxu1 }
 0x290   :  { %v1734_v62 = vpop.f32.mrf.mxu0  ;;  %v1700_v63 = vpop.f32.mrf.mxu1 }
 0x291   :  { %v1701_v51 = vadd.f32 %v1700_v63, %v1699_v60 }
 0x292   :  { %v1735_v50 = vpop.f32.mrf.mxu0 }
 0x293   :  { %v992_v12 = vadd.f32 %v1701_v51, %v1603_v9  ;;  %v1736_v13 = vadd.f32 %v1735_v50, %v1734_v62 }
 0x295   :  { %v1062_v16 = vadd.f32 %v1736_v13, %v992_v12 }
 0x2b0   :  { %v1769_v8 = vpop.f32.mrf.mxu1 }
 0x2b2   :  { %v1804_v11 = vpop.f32.mrf.mxu0  ;;  %v1770_v53 = vpop.f32.mrf.mxu1 }
 0x2b3   :  { %v1771_v14 = vadd.f32 %v1770_v53, %v1769_v8 }
 0x2b4   :  { %v1805_v15 = vpop.f32.mrf.mxu0 }
 0x2b5   :  { %v1132_v20 = vadd.f32 %v1771_v14, %v1062_v16  ;;  %v1806_v25 = vadd.f32 %v1805_v15, %v1804_v11 }
 0x2b7   :  { %v1202_v28 = vadd.f32 %v1806_v25, %v1132_v20 }
 0x2d2   :  { %v1839_v52 = vpop.f32.mrf.mxu1 }
 0x2d4   :  { %v1874_v18 = vpop.f32.mrf.mxu0  ;;  %v1840_v10 = vpop.f32.mrf.mxu1 }
 0x2d5   :  { %v1841_v26 = vadd.f32 %v1840_v10, %v1839_v52 }
 0x2d6   :  { %v1875_v27 = vpop.f32.mrf.mxu0 }
 0x2d7   :  { %v1272_v29 = vadd.f32 %v1841_v26, %v1202_v28  ;;  %v1876_v30 = vadd.f32 %v1875_v27, %v1874_v18 }
 0x2d9   :  { %v1342_v35 = vadd.f32 %v1876_v30, %v1272_v29 }
 0x2f4   :  { %v1909_v31 = vpop.f32.mrf.mxu1 }
 0x2f5   :  { %v1944_v32 = vpop.f32.mrf.mxu0 }
 0x2f6   :  { %v1910_v33 = vpop.f32.mrf.mxu1 }
 0x2f7   :  { %v1945_v34 = vpop.f32.mrf.mxu0  ;;  %v1911_v36 = vadd.f32 %v1910_v33, %v1909_v31 }
 0x2f8   :  { %v1946_v38 = vadd.f32 %v1945_v34, %v1944_v32 }
 0x2f9   :  { %v1412_v37 = vadd.f32 %v1911_v36, %v1342_v35 }
 0x2fb   :  { %v1482_v39 = vadd.f32 %v1946_v38, %v1412_v37 }
 0x2fd   :  { %v1485_v40 = vmax.f32 %v1482_v39, 0.0 }
 0x2ff   :  { %2075 = vmatmul.mubr.msk.f32.vlgmr.msra.gmra.mxu1 %vm139_vm1, %v1485_v40 }
 0x3bf   :  { %v1566_v42 = vpop.f32.mrf.mxu1 }
 0x3c0   :  { %v1567_v43 = vadd.f32 %v1604_v41, %v1566_v42 }
 0x3c1   :  { %v2076_v44 = vpop.f32.mrf.mxu1 }
 0x3c2   :  { %1571 = vst.msk [vmem:[#allocation14] sm:$0x3] %vm1570_vm9, %v1567_v43 }
 0x3c3   :  { %2189 = shalt.err (!%p2186_p10)
}
 0x3c4   :  { %1581 = dma.vmem_to_hbm [thread:$0]  %s1579_s19, 32, %s2427_s8, [#allocation8]  }
 0x3c5   :  { %2206 = dma.done.wait [#allocation8], 32  }
 0x3c6   :  { %2207 = vsyncadd [#allocation8], 4294967264 }
 0x3c7   :  { %1585 = vsyncpa [#allocation7], 1 }
 0x3c8   :  { %1586 = vsyncpa [#allocation12], 1 }
 0x3c9   :  { %1587 = vsyncpa [#allocation8], 1 }
 0x3ca   :  { %1588 = vsyncpa [#allocation9], 1 }
 0x3cb   :  { %1589 = vsyncmov [#allocation5] }
 0x3ce   :  { %s1590_s7 = vpop.sfrf %1589 }
 0x3cf   :  { %p1606_p11 = scmp.ne.s32.totalorder %s1590_s7, 0 }
 0x3d1   :  { %1594 = shalt.err (%p1606_p11)  }

</bundles_post_ra>
